<compile_context>
chip_gen: v5e
topology: v5e:2x2
jax: 0.10.0
libtpu: 0.0.40
codegen_flags: <defaults>
</compile_context>

<pallas_src>
import functools

import jax
import jax.numpy as jnp
from jax.experimental import pallas as pl
from jax.experimental.pallas import tpu as pltpu


# ----------------------------------------------------------------------------
# Fused encoder kernel: projection + bidirectional LSTM + sum over time.
# ----------------------------------------------------------------------------
def _encoder_kernel(x_ref, pw_ref, pb_ref,
                    wihf_ref, whhf_ref, bf_ref,
                    wihb_ref, whhb_ref, bb_ref,
                    out_ref, *, seq, batch, hidden):
    """x_ref: (S*2B, E) embedded tokens, row = t*2B + b (premise cols first).

    pw: (E, E) bf16 projection; wih_*: (E, 4H) bf16; whh_*: (H, 4H) bf16;
    biases f32 (b_ih + b_hh combined). PyTorch gate order: i, f, g, o.
    out_ref: (B, 4H) = [prem_fwd_sum | prem_bwd_sum | hyp_fwd_sum | hyp_bwd_sum].
    """
    S, B, H = seq, batch, hidden
    B2 = 2 * B

    # ---- projection Linear + ReLU on the whole (S*2B, E) slab (one matmul) ----
    x = x_ref[...].astype(jnp.bfloat16)
    proj = jnp.dot(x, pw_ref[...], preferred_element_type=jnp.float32) + pb_ref[...]
    proj = jnp.maximum(proj, 0.0).astype(jnp.bfloat16)

    # ---- hoisted input->gate matmuls (+ bias) for both directions ----
    gx_f = jnp.dot(proj, wihf_ref[...],
                   preferred_element_type=jnp.float32) + bf_ref[...]   # (S*2B, 4H)
    gx_b = jnp.dot(proj, wihb_ref[...],
                   preferred_element_type=jnp.float32) + bb_ref[...]   # (S*2B, 4H)

    whh_f = whhf_ref[...]
    whh_b = whhb_ref[...]

    def apply_gates(gates, c):
        i_g = jax.nn.sigmoid(gates[:, 0 * H:1 * H])
        f_g = jax.nn.sigmoid(gates[:, 1 * H:2 * H])
        g_g = jnp.tanh(gates[:, 2 * H:3 * H])
        o_g = jax.nn.sigmoid(gates[:, 3 * H:4 * H])
        c_new = f_g * c + i_g * g_g
        h_new = o_g * jnp.tanh(c_new)
        return h_new, c_new

    zeros = jnp.zeros((B2, H), jnp.float32)
    h_f = c_f = hs_f = zeros
    h_b = c_b = hs_b = zeros

    # ---- fully-unrolled recurrence; fwd & bwd directions interleave so their
    #      MXU pushes / EUP sigmoid-tanh / VPU gate math overlap. Only h@W_hh
    #      remains on the serial critical path.
    for t in range(S):
        g_f = gx_f[t * B2:(t + 1) * B2, :] + jnp.dot(
            h_f.astype(jnp.bfloat16), whh_f, preferred_element_type=jnp.float32)
        g_b = gx_b[(S - 1 - t) * B2:(S - t) * B2, :] + jnp.dot(
            h_b.astype(jnp.bfloat16), whh_b, preferred_element_type=jnp.float32)
        h_f, c_f = apply_gates(g_f, c_f)
        h_b, c_b = apply_gates(g_b, c_b)
        hs_f = hs_f + h_f
        hs_b = hs_b + h_b

    # ---- lane-dense (B, 4H) output, already in the head's layout ----
    out_ref[:, 0 * H:1 * H] = hs_f[:B, :]   # premise, forward
    out_ref[:, 1 * H:2 * H] = hs_b[:B, :]   # premise, backward
    out_ref[:, 2 * H:3 * H] = hs_f[B:, :]   # hypothesis, forward
    out_ref[:, 3 * H:4 * H] = hs_b[B:, :]   # hypothesis, backward


def pallas_encode(x_flat, params, *, seq, batch, hidden):
    """x_flat: (S*2B, E) f32 embedded tokens -> (B, 4H) f32 encodings."""
    R, E = x_flat.shape
    H = hidden
    kernel = functools.partial(_encoder_kernel, seq=seq, batch=batch, hidden=H)
    return pl.pallas_call(
        kernel,
        out_shape=jax.ShapeDtypeStruct((batch, 4 * H), jnp.float32),
        grid=(1,),
        in_specs=[
            pl.BlockSpec((R, E), lambda i: (0, 0)),
            pl.BlockSpec((E, E), lambda i: (0, 0)),
            pl.BlockSpec((1, E), lambda i: (0, 0)),
            pl.BlockSpec((E, 4 * H), lambda i: (0, 0)),
            pl.BlockSpec((H, 4 * H), lambda i: (0, 0)),
            pl.BlockSpec((1, 4 * H), lambda i: (0, 0)),
            pl.BlockSpec((E, 4 * H), lambda i: (0, 0)),
            pl.BlockSpec((H, 4 * H), lambda i: (0, 0)),
            pl.BlockSpec((1, 4 * H), lambda i: (0, 0)),
        ],
        out_specs=pl.BlockSpec((batch, 4 * H), lambda i: (0, 0)),
        compiler_params=pltpu.CompilerParams(dimension_semantics=("arbitrary",)),
    )(x_flat,
      params["proj_w"], params["proj_b"],
      params["wih_f"], params["whh_f"], params["bias_f"],
      params["wih_b"], params["whh_b"], params["bias_b"])


# ----------------------------------------------------------------------------
# Fused MLP head kernel: (num_out_layers-1) x [Linear+ReLU] + final Linear.
# ----------------------------------------------------------------------------
def _mlp_kernel(x_ref, w_ref, b_ref, wf_ref, bfin_ref, out_ref, *, num_hidden):
    y = x_ref[...]                                   # (B, D) f32
    for i in range(num_hidden):                      # static, fully unrolled
        y = jnp.dot(y.astype(jnp.bfloat16), w_ref[i],
                    preferred_element_type=jnp.float32) + b_ref[i]
        y = jnp.maximum(y, 0.0)
    y = jnp.dot(y.astype(jnp.bfloat16), wf_ref[...],
                preferred_element_type=jnp.float32) + bfin_ref[...]
    out_ref[...] = y.astype(out_ref.dtype)


def pallas_mlp_head(x, w_stack, b_stack, w_final, b_final):
    B, D = x.shape
    L = w_stack.shape[0]
    OUT = w_final.shape[1]
    return pl.pallas_call(
        functools.partial(_mlp_kernel, num_hidden=L),
        out_shape=jax.ShapeDtypeStruct((B, OUT), jnp.float32),
        grid=(1,),
        in_specs=[
            pl.BlockSpec((B, D), lambda i: (0, 0)),
            pl.BlockSpec((L, D, D), lambda i: (0, 0, 0)),
            pl.BlockSpec((L, 1, D), lambda i: (0, 0, 0)),
            pl.BlockSpec((D, OUT), lambda i: (0, 0)),
            pl.BlockSpec((1, OUT), lambda i: (0, 0)),
        ],
        out_specs=pl.BlockSpec((B, OUT), lambda i: (0, 0)),
        compiler_params=pltpu.CompilerParams(dimension_semantics=("arbitrary",)),
    )(x, w_stack, b_stack, w_final, b_final)


# ----------------------------------------------------------------------------
# Params + forward (glue in plain JAX, compute in the two Pallas kernels).
# ----------------------------------------------------------------------------
def init_params(key, *, vocab, emb_dim, hidden, output_dim, num_out_layers):
    assert num_out_layers >= 2
    keys = jax.random.split(key, 16)

    def u(k, shape, scale, dtype=jnp.float32):
        return jax.random.uniform(k, shape, jnp.float32, -scale, scale).astype(dtype)

    params = {}
    emb = jax.random.normal(keys[0], (vocab, emb_dim), jnp.float32) * 0.1
    params["embedding"] = emb.at[0].set(0.0)          # padding_idx = 0

    s = 1.0 / float(emb_dim) ** 0.5
    params["proj_w"] = u(keys[1], (emb_dim, emb_dim), s, jnp.bfloat16)  # (in, out)
    params["proj_b"] = u(keys[2], (1, emb_dim), s)

    sh = 1.0 / float(hidden) ** 0.5
    params["wih_f"] = u(keys[3], (emb_dim, 4 * hidden), sh, jnp.bfloat16)
    params["whh_f"] = u(keys[4], (hidden, 4 * hidden), sh, jnp.bfloat16)
    params["bias_f"] = u(keys[5], (1, 4 * hidden), sh)    # b_ih + b_hh combined
    params["wih_b"] = u(keys[6], (emb_dim, 4 * hidden), sh, jnp.bfloat16)
    params["whh_b"] = u(keys[7], (hidden, 4 * hidden), sh, jnp.bfloat16)
    params["bias_b"] = u(keys[8], (1, 4 * hidden), sh)

    lin_dim = hidden * 2 * 2                              # bidirectional, prem||hyp
    sl = 1.0 / float(lin_dim) ** 0.5
    nh = num_out_layers - 1
    params["out_w_stack"] = u(keys[9], (nh, lin_dim, lin_dim), sl, jnp.bfloat16)
    params["out_b_stack"] = u(keys[10], (nh, 1, lin_dim), sl)
    params["out_w_final"] = u(keys[11], (lin_dim, output_dim), sl, jnp.bfloat16)
    params["out_b_final"] = u(keys[12], (1, output_dim), sl)
    return params


def rnn_nli_forward(params, premise, hypothesis, *, hidden):
    # premise / hypothesis: (seq, batch) int32 token ids (seq-first, like nn.LSTM).
    S, B = premise.shape
    # One shared-weight encoder pass: stack premise & hypothesis along batch.
    tokens = jnp.concatenate([premise, hypothesis], axis=1)            # (S, 2B)
    emb = jnp.take(params["embedding"], tokens.reshape(-1), axis=0)    # (S*2B, E) glue
    combined = pallas_encode(emb, params, seq=S, batch=B, hidden=hidden)  # (B, 4H)
    # dropout_p = 0.0 / eval mode => dropout is the identity (omitted).
    return pallas_mlp_head(combined,
                           params["out_w_stack"], params["out_b_stack"],
                           params["out_w_final"], params["out_b_final"])


# ----------------------------------------------------------------------------
if __name__ == "__main__":
    VOCAB = 50
    EMB = 32
    HID = 32
    OUT = 3
    NUM_OUT_LAYERS = 4
    SEQ = 8
    BATCH = 4

    key = jax.random.PRNGKey(0)
    k_par, k_prem, k_hyp = jax.random.split(key, 3)

    params = init_params(k_par, vocab=VOCAB, emb_dim=EMB, hidden=HID,
                         output_dim=OUT, num_out_layers=NUM_OUT_LAYERS)

    premise = jax.random.randint(k_prem, (SEQ, BATCH), 1, VOCAB, dtype=jnp.int32)
    hypothesis = jax.random.randint(k_hyp, (SEQ, BATCH), 1, VOCAB, dtype=jnp.int32)

    fwd = jax.jit(functools.partial(rnn_nli_forward, hidden=HID))
    logits = jax.block_until_ready(fwd(params, premise, hypothesis))

    assert logits.shape == (BATCH, OUT), logits.shape
    assert bool(jnp.all(jnp.isfinite(logits)))
    print("KERNEL_OK")
</pallas_src>

<mosaic_0001>
module attributes {stable_mosaic.version = 11 : i64} {
  func.func @_mlp_kernel(%arg0: i32, %arg1: memref<4x128xf32, #tpu.memory_space<vmem>>, %arg2: memref<3x128x128xbf16, #tpu.memory_space<vmem>>, %arg3: memref<3x1x128xf32, #tpu.memory_space<vmem>>, %arg4: memref<128x3xbf16, #tpu.memory_space<vmem>>, %arg5: memref<1x3xf32, #tpu.memory_space<vmem>>, %arg6: memref<4x3xf32, #tpu.memory_space<vmem>>) attributes {dimension_semantics = [#tpu.dimension_semantics<arbitrary>], iteration_bounds = array<i64: 1>, scalar_prefetch = 0 : i64, scratch_operands = 0 : i64, tpu.core_type = #tpu.core_type<tc>, window_params = [{pipeline_mode = #tpu.pipeline_mode<synchronous>, transform_indices = @transform_0, window_bounds = array<i64: 4, 128>}, {pipeline_mode = #tpu.pipeline_mode<synchronous>, transform_indices = @transform_1, window_bounds = array<i64: 3, 128, 128>}, {pipeline_mode = #tpu.pipeline_mode<synchronous>, transform_indices = @transform_2, window_bounds = array<i64: 3, 1, 128>}, {pipeline_mode = #tpu.pipeline_mode<synchronous>, transform_indices = @transform_3, window_bounds = array<i64: 128, 3>}, {pipeline_mode = #tpu.pipeline_mode<synchronous>, transform_indices = @transform_4, window_bounds = array<i64: 1, 3>}, {pipeline_mode = #tpu.pipeline_mode<synchronous>, transform_indices = @transform_5, window_bounds = array<i64: 4, 3>}]} {
    %c0 = arith.constant 0 : index
    %c0_0 = arith.constant 0 : index
    %0 = vector.load %arg1[%c0, %c0_0] : memref<4x128xf32, #tpu.memory_space<vmem>>, vector<4x128xf32>
    %1 = arith.truncf %0 : vector<4x128xf32> to vector<4x128xbf16>
    %c0_1 = arith.constant 0 : index
    %c0_2 = arith.constant 0 : index
    %c0_3 = arith.constant 0 : index
    %2 = vector.load %arg2[%c0_1, %c0_2, %c0_3] : memref<3x128x128xbf16, #tpu.memory_space<vmem>>, vector<1x128x128xbf16>
    %3 = vector.shape_cast %2 : vector<1x128x128xbf16> to vector<128x128xbf16>
    %cst = arith.constant dense<0.000000e+00> : vector<4x128xf32>
    %4 = tpu.matmul %1, %3, %cst {dimension_numbers = #tpu.dot_dimension_numbers<[1], [0], [0], [1], [0, 0, 1, 1], [], []>} : vector<4x128xbf16>, vector<128x128xbf16>, vector<4x128xf32> -> vector<4x128xf32>
    %c0_4 = arith.constant 0 : index
    %c0_5 = arith.constant 0 : index
    %c0_6 = arith.constant 0 : index
    %5 = vector.load %arg3[%c0_4, %c0_5, %c0_6] : memref<3x1x128xf32, #tpu.memory_space<vmem>>, vector<1x1x128xf32>
    %6 = vector.shape_cast %5 : vector<1x1x128xf32> to vector<1x128xf32>
    %7 = vector.broadcast %6 : vector<1x128xf32> to vector<4x128xf32>
    %8 = arith.addf %4, %7 : vector<4x128xf32>
    %cst_7 = arith.constant 0.000000e+00 : f32
    %9 = vector.broadcast %cst_7 : f32 to vector<4x128xf32>
    %10 = arith.maximumf %8, %9 : vector<4x128xf32>
    %11 = arith.truncf %10 : vector<4x128xf32> to vector<4x128xbf16>
    %c1 = arith.constant 1 : index
    %c0_8 = arith.constant 0 : index
    %c0_9 = arith.constant 0 : index
    %12 = vector.load %arg2[%c1, %c0_8, %c0_9] : memref<3x128x128xbf16, #tpu.memory_space<vmem>>, vector<1x128x128xbf16>
    %13 = vector.shape_cast %12 : vector<1x128x128xbf16> to vector<128x128xbf16>
    %cst_10 = arith.constant dense<0.000000e+00> : vector<4x128xf32>
    %14 = tpu.matmul %11, %13, %cst_10 {dimension_numbers = #tpu.dot_dimension_numbers<[1], [0], [0], [1], [0, 0, 1, 1], [], []>} : vector<4x128xbf16>, vector<128x128xbf16>, vector<4x128xf32> -> vector<4x128xf32>
    %c1_11 = arith.constant 1 : index
    %c0_12 = arith.constant 0 : index
    %c0_13 = arith.constant 0 : index
    %15 = vector.load %arg3[%c1_11, %c0_12, %c0_13] : memref<3x1x128xf32, #tpu.memory_space<vmem>>, vector<1x1x128xf32>
    %16 = vector.shape_cast %15 : vector<1x1x128xf32> to vector<1x128xf32>
    %17 = vector.broadcast %16 : vector<1x128xf32> to vector<4x128xf32>
    %18 = arith.addf %14, %17 : vector<4x128xf32>
    %cst_14 = arith.constant 0.000000e+00 : f32
    %19 = vector.broadcast %cst_14 : f32 to vector<4x128xf32>
    %20 = arith.maximumf %18, %19 : vector<4x128xf32>
    %21 = arith.truncf %20 : vector<4x128xf32> to vector<4x128xbf16>
    %c2 = arith.constant 2 : index
    %c0_15 = arith.constant 0 : index
    %c0_16 = arith.constant 0 : index
    %22 = vector.load %arg2[%c2, %c0_15, %c0_16] : memref<3x128x128xbf16, #tpu.memory_space<vmem>>, vector<1x128x128xbf16>
    %23 = vector.shape_cast %22 : vector<1x128x128xbf16> to vector<128x128xbf16>
    %cst_17 = arith.constant dense<0.000000e+00> : vector<4x128xf32>
    %24 = tpu.matmul %21, %23, %cst_17 {dimension_numbers = #tpu.dot_dimension_numbers<[1], [0], [0], [1], [0, 0, 1, 1], [], []>} : vector<4x128xbf16>, vector<128x128xbf16>, vector<4x128xf32> -> vector<4x128xf32>
    %c2_18 = arith.constant 2 : index
    %c0_19 = arith.constant 0 : index
    %c0_20 = arith.constant 0 : index
    %25 = vector.load %arg3[%c2_18, %c0_19, %c0_20] : memref<3x1x128xf32, #tpu.memory_space<vmem>>, vector<1x1x128xf32>
    %26 = vector.shape_cast %25 : vector<1x1x128xf32> to vector<1x128xf32>
    %27 = vector.broadcast %26 : vector<1x128xf32> to vector<4x128xf32>
    %28 = arith.addf %24, %27 : vector<4x128xf32>
    %cst_21 = arith.constant 0.000000e+00 : f32
    %29 = vector.broadcast %cst_21 : f32 to vector<4x128xf32>
    %30 = arith.maximumf %28, %29 : vector<4x128xf32>
    %31 = arith.truncf %30 : vector<4x128xf32> to vector<4x128xbf16>
    %c0_22 = arith.constant 0 : index
    %c0_23 = arith.constant 0 : index
    %32 = vector.load %arg4[%c0_22, %c0_23] : memref<128x3xbf16, #tpu.memory_space<vmem>>, vector<128x3xbf16>
    %cst_24 = arith.constant dense<0.000000e+00> : vector<4x3xf32>
    %33 = tpu.matmul %31, %32, %cst_24 {dimension_numbers = #tpu.dot_dimension_numbers<[1], [0], [0], [1], [0, 0, 1, 1], [], []>} : vector<4x128xbf16>, vector<128x3xbf16>, vector<4x3xf32> -> vector<4x3xf32>
    %c0_25 = arith.constant 0 : index
    %c0_26 = arith.constant 0 : index
    %34 = vector.load %arg5[%c0_25, %c0_26] : memref<1x3xf32, #tpu.memory_space<vmem>>, vector<1x3xf32>
    %35 = vector.broadcast %34 : vector<1x3xf32> to vector<4x3xf32>
    %36 = arith.addf %33, %35 : vector<4x3xf32>
    %c0_27 = arith.constant 0 : index
    %c0_28 = arith.constant 0 : index
    %37 = vector.load %arg6[%c0_27, %c0_28] : memref<4x3xf32, #tpu.memory_space<vmem>>, vector<4x3xf32>
    tpu.vector_store %arg6[%c0_27, %c0_28], %36 {strides = array<i32>} : memref<4x3xf32, #tpu.memory_space<vmem>>, vector<4x3xf32>,
    return
  }
  func.func @transform_0(%arg0: i32) -> (i32, i32) {
    %c0_i32 = arith.constant 0 : i32
    %c0_i32_0 = arith.constant 0 : i32
    %c0_i32_1 = arith.constant 0 : i32
    return %c0_i32, %c0_i32_0 : i32, i32
  }
  func.func @transform_1(%arg0: i32) -> (i32, i32, i32) {
    %c0_i32 = arith.constant 0 : i32
    %c0_i32_0 = arith.constant 0 : i32
    %c0_i32_1 = arith.constant 0 : i32
    %c0_i32_2 = arith.constant 0 : i32
    return %c0_i32, %c0_i32_0, %c0_i32_1 : i32, i32, i32
  }
  func.func @transform_2(%arg0: i32) -> (i32, i32, i32) {
    %c0_i32 = arith.constant 0 : i32
    %c0_i32_0 = arith.constant 0 : i32
    %c0_i32_1 = arith.constant 0 : i32
    %c0_i32_2 = arith.constant 0 : i32
    return %c0_i32, %c0_i32_0, %c0_i32_1 : i32, i32, i32
  }
  func.func @transform_3(%arg0: i32) -> (i32, i32) {
    %c0_i32 = arith.constant 0 : i32
    %c0_i32_0 = arith.constant 0 : i32
    %c0_i32_1 = arith.constant 0 : i32
    return %c0_i32, %c0_i32_0 : i32, i32
  }
  func.func @transform_4(%arg0: i32) -> (i32, i32) {
    %c0_i32 = arith.constant 0 : i32
    %c0_i32_0 = arith.constant 0 : i32
    %c0_i32_1 = arith.constant 0 : i32
    return %c0_i32, %c0_i32_0 : i32, i32
  }
  func.func @transform_5(%arg0: i32) -> (i32, i32) {
    %c0_i32 = arith.constant 0 : i32
    %c0_i32_0 = arith.constant 0 : i32
    %c0_i32_1 = arith.constant 0 : i32
    return %c0_i32, %c0_i32_0 : i32, i32
  }
}

module attributes {stable_mosaic.version = 11 : i64} {
  func.func @_encoder_kernel(%arg0: i32, %arg1: memref<64x32xf32, #tpu.memory_space<vmem>>, %arg2: memref<32x32xbf16, #tpu.memory_space<vmem>>, %arg3: memref<1x32xf32, #tpu.memory_space<vmem>>, %arg4: memref<32x128xbf16, #tpu.memory_space<vmem>>, %arg5: memref<32x128xbf16, #tpu.memory_space<vmem>>, %arg6: memref<1x128xf32, #tpu.memory_space<vmem>>, %arg7: memref<32x128xbf16, #tpu.memory_space<vmem>>, %arg8: memref<32x128xbf16, #tpu.memory_space<vmem>>, %arg9: memref<1x128xf32, #tpu.memory_space<vmem>>, %arg10: memref<4x128xf32, #tpu.memory_space<vmem>>) attributes {dimension_semantics = [#tpu.dimension_semantics<arbitrary>], iteration_bounds = array<i64: 1>, scalar_prefetch = 0 : i64, scratch_operands = 0 : i64, tpu.core_type = #tpu.core_type<tc>, window_params = [{pipeline_mode = #tpu.pipeline_mode<synchronous>, transform_indices = @transform_0, window_bounds = array<i64: 64, 32>}, {pipeline_mode = #tpu.pipeline_mode<synchronous>, transform_indices = @transform_1, window_bounds = array<i64: 32, 32>}, {pipeline_mode = #tpu.pipeline_mode<synchronous>, transform_indices = @transform_2, window_bounds = array<i64: 1, 32>}, {pipeline_mode = #tpu.pipeline_mode<synchronous>, transform_indices = @transform_3, window_bounds = array<i64: 32, 128>}, {pipeline_mode = #tpu.pipeline_mode<synchronous>, transform_indices = @transform_4, window_bounds = array<i64: 32, 128>}, {pipeline_mode = #tpu.pipeline_mode<synchronous>, transform_indices = @transform_5, window_bounds = array<i64: 1, 128>}, {pipeline_mode = #tpu.pipeline_mode<synchronous>, transform_indices = @transform_6, window_bounds = array<i64: 32, 128>}, {pipeline_mode = #tpu.pipeline_mode<synchronous>, transform_indices = @transform_7, window_bounds = array<i64: 32, 128>}, {pipeline_mode = #tpu.pipeline_mode<synchronous>, transform_indices = @transform_8, window_bounds = array<i64: 1, 128>}, {pipeline_mode = #tpu.pipeline_mode<synchronous>, transform_indices = @transform_9, window_bounds = array<i64: 4, 128>}]} {
    %c0 = arith.constant 0 : index
    %c0_0 = arith.constant 0 : index
    %0 = vector.load %arg1[%c0, %c0_0] : memref<64x32xf32, #tpu.memory_space<vmem>>, vector<64x32xf32>
    %1 = arith.truncf %0 : vector<64x32xf32> to vector<64x32xbf16>
    %c0_1 = arith.constant 0 : index
    %c0_2 = arith.constant 0 : index
    %2 = vector.load %arg2[%c0_1, %c0_2] : memref<32x32xbf16, #tpu.memory_space<vmem>>, vector<32x32xbf16>
    %cst = arith.constant dense<0.000000e+00> : vector<64x32xf32>
    %3 = tpu.matmul %1, %2, %cst {dimension_numbers = #tpu.dot_dimension_numbers<[1], [0], [0], [1], [0, 0, 1, 1], [], []>} : vector<64x32xbf16>, vector<32x32xbf16>, vector<64x32xf32> -> vector<64x32xf32>
    %c0_3 = arith.constant 0 : index
    %c0_4 = arith.constant 0 : index
    %4 = vector.load %arg3[%c0_3, %c0_4] : memref<1x32xf32, #tpu.memory_space<vmem>>, vector<1x32xf32>
    %5 = vector.broadcast %4 : vector<1x32xf32> to vector<64x32xf32>
    %6 = arith.addf %3, %5 : vector<64x32xf32>
    %cst_5 = arith.constant 0.000000e+00 : f32
    %7 = vector.broadcast %cst_5 : f32 to vector<64x32xf32>
    %8 = arith.maximumf %6, %7 : vector<64x32xf32>
    %9 = arith.truncf %8 : vector<64x32xf32> to vector<64x32xbf16>
    %c0_6 = arith.constant 0 : index
    %c0_7 = arith.constant 0 : index
    %10 = vector.load %arg4[%c0_6, %c0_7] : memref<32x128xbf16, #tpu.memory_space<vmem>>, vector<32x128xbf16>
    %cst_8 = arith.constant dense<0.000000e+00> : vector<64x128xf32>
    %11 = tpu.matmul %9, %10, %cst_8 {dimension_numbers = #tpu.dot_dimension_numbers<[1], [0], [0], [1], [0, 0, 1, 1], [], []>} : vector<64x32xbf16>, vector<32x128xbf16>, vector<64x128xf32> -> vector<64x128xf32>
    %c0_9 = arith.constant 0 : index
    %c0_10 = arith.constant 0 : index
    %12 = vector.load %arg6[%c0_9, %c0_10] : memref<1x128xf32, #tpu.memory_space<vmem>>, vector<1x128xf32>
    %13 = vector.broadcast %12 : vector<1x128xf32> to vector<64x128xf32>
    %14 = arith.addf %11, %13 : vector<64x128xf32>
    %c0_11 = arith.constant 0 : index
    %c0_12 = arith.constant 0 : index
    %15 = vector.load %arg7[%c0_11, %c0_12] : memref<32x128xbf16, #tpu.memory_space<vmem>>, vector<32x128xbf16>
    %cst_13 = arith.constant dense<0.000000e+00> : vector<64x128xf32>
    %16 = tpu.matmul %9, %15, %cst_13 {dimension_numbers = #tpu.dot_dimension_numbers<[1], [0], [0], [1], [0, 0, 1, 1], [], []>} : vector<64x32xbf16>, vector<32x128xbf16>, vector<64x128xf32> -> vector<64x128xf32>
    %c0_14 = arith.constant 0 : index
    %c0_15 = arith.constant 0 : index
    %17 = vector.load %arg9[%c0_14, %c0_15] : memref<1x128xf32, #tpu.memory_space<vmem>>, vector<1x128xf32>
    %18 = vector.broadcast %17 : vector<1x128xf32> to vector<64x128xf32>
    %19 = arith.addf %16, %18 : vector<64x128xf32>
    %c0_16 = arith.constant 0 : index
    %c0_17 = arith.constant 0 : index
    %20 = vector.load %arg5[%c0_16, %c0_17] : memref<32x128xbf16, #tpu.memory_space<vmem>>, vector<32x128xbf16>
    %c0_18 = arith.constant 0 : index
    %c0_19 = arith.constant 0 : index
    %21 = vector.load %arg8[%c0_18, %c0_19] : memref<32x128xbf16, #tpu.memory_space<vmem>>, vector<32x128xbf16>
    %cst_20 = arith.constant 0.000000e+00 : f32
    %22 = vector.broadcast %cst_20 : f32 to vector<8x32xf32>
    %23 = vector.extract_strided_slice %14 {offsets = [0, 0], sizes = [8, 128], strides = [1, 1]} : vector<64x128xf32> to vector<8x128xf32>
    %24 = arith.truncf %22 : vector<8x32xf32> to vector<8x32xbf16>
    %cst_21 = arith.constant dense<0.000000e+00> : vector<8x128xf32>
    %25 = tpu.matmul %24, %20, %cst_21 {dimension_numbers = #tpu.dot_dimension_numbers<[1], [0], [0], [1], [0, 0, 1, 1], [], []>} : vector<8x32xbf16>, vector<32x128xbf16>, vector<8x128xf32> -> vector<8x128xf32>
    %26 = arith.addf %23, %25 : vector<8x128xf32>
    %27 = vector.extract_strided_slice %19 {offsets = [56, 0], sizes = [8, 128], strides = [1, 1]} : vector<64x128xf32> to vector<8x128xf32>
    %28 = arith.truncf %22 : vector<8x32xf32> to vector<8x32xbf16>
    %cst_22 = arith.constant dense<0.000000e+00> : vector<8x128xf32>
    %29 = tpu.matmul %28, %21, %cst_22 {dimension_numbers = #tpu.dot_dimension_numbers<[1], [0], [0], [1], [0, 0, 1, 1], [], []>} : vector<8x32xbf16>, vector<32x128xbf16>, vector<8x128xf32> -> vector<8x128xf32>
    %30 = arith.addf %27, %29 : vector<8x128xf32>
    %31 = vector.extract_strided_slice %26 {offsets = [0, 0], sizes = [8, 32], strides = [1, 1]} : vector<8x128xf32> to vector<8x32xf32>
    %32 = arith.negf %31 : vector<8x32xf32>
    %33 = math.exp %32 : vector<8x32xf32>
    %cst_23 = arith.constant 1.000000e+00 : f32
    %34 = vector.broadcast %cst_23 : f32 to vector<8x32xf32>
    %35 = arith.addf %34, %33 : vector<8x32xf32>
    %36 = arith.divf %34, %35 : vector<8x32xf32>
    %37 = vector.extract_strided_slice %26 {offsets = [0, 32], sizes = [8, 32], strides = [1, 1]} : vector<8x128xf32> to vector<8x32xf32>
    %38 = arith.negf %37 : vector<8x32xf32>
    %39 = math.exp %38 : vector<8x32xf32>
    %cst_24 = arith.constant 1.000000e+00 : f32
    %40 = vector.broadcast %cst_24 : f32 to vector<8x32xf32>
    %41 = arith.addf %40, %39 : vector<8x32xf32>
    %42 = arith.divf %40, %41 : vector<8x32xf32>
    %43 = vector.extract_strided_slice %26 {offsets = [0, 64], sizes = [8, 32], strides = [1, 1]} : vector<8x128xf32> to vector<8x32xf32>
    %44 = math.tanh %43 : vector<8x32xf32>
    %45 = vector.extract_strided_slice %26 {offsets = [0, 96], sizes = [8, 32], strides = [1, 1]} : vector<8x128xf32> to vector<8x32xf32>
    %46 = arith.negf %45 : vector<8x32xf32>
    %47 = math.exp %46 : vector<8x32xf32>
    %cst_25 = arith.constant 1.000000e+00 : f32
    %48 = vector.broadcast %cst_25 : f32 to vector<8x32xf32>
    %49 = arith.addf %48, %47 : vector<8x32xf32>
    %50 = arith.divf %48, %49 : vector<8x32xf32>
    %51 = arith.mulf %42, %22 : vector<8x32xf32>
    %52 = arith.mulf %36, %44 : vector<8x32xf32>
    %53 = arith.addf %51, %52 : vector<8x32xf32>
    %54 = math.tanh %53 : vector<8x32xf32>
    %55 = arith.mulf %50, %54 : vector<8x32xf32>
    %56 = vector.extract_strided_slice %30 {offsets = [0, 0], sizes = [8, 32], strides = [1, 1]} : vector<8x128xf32> to vector<8x32xf32>
    %57 = arith.negf %56 : vector<8x32xf32>
    %58 = math.exp %57 : vector<8x32xf32>
    %cst_26 = arith.constant 1.000000e+00 : f32
    %59 = vector.broadcast %cst_26 : f32 to vector<8x32xf32>
    %60 = arith.addf %59, %58 : vector<8x32xf32>
    %61 = arith.divf %59, %60 : vector<8x32xf32>
    %62 = vector.extract_strided_slice %30 {offsets = [0, 32], sizes = [8, 32], strides = [1, 1]} : vector<8x128xf32> to vector<8x32xf32>
    %63 = arith.negf %62 : vector<8x32xf32>
    %64 = math.exp %63 : vector<8x32xf32>
    %cst_27 = arith.constant 1.000000e+00 : f32
    %65 = vector.broadcast %cst_27 : f32 to vector<8x32xf32>
    %66 = arith.addf %65, %64 : vector<8x32xf32>
    %67 = arith.divf %65, %66 : vector<8x32xf32>
    %68 = vector.extract_strided_slice %30 {offsets = [0, 64], sizes = [8, 32], strides = [1, 1]} : vector<8x128xf32> to vector<8x32xf32>
    %69 = math.tanh %68 : vector<8x32xf32>
    %70 = vector.extract_strided_slice %30 {offsets = [0, 96], sizes = [8, 32], strides = [1, 1]} : vector<8x128xf32> to vector<8x32xf32>
    %71 = arith.negf %70 : vector<8x32xf32>
    %72 = math.exp %71 : vector<8x32xf32>
    %cst_28 = arith.constant 1.000000e+00 : f32
    %73 = vector.broadcast %cst_28 : f32 to vector<8x32xf32>
    %74 = arith.addf %73, %72 : vector<8x32xf32>
    %75 = arith.divf %73, %74 : vector<8x32xf32>
    %76 = arith.mulf %67, %22 : vector<8x32xf32>
    %77 = arith.mulf %61, %69 : vector<8x32xf32>
    %78 = arith.addf %76, %77 : vector<8x32xf32>
    %79 = math.tanh %78 : vector<8x32xf32>
    %80 = arith.mulf %75, %79 : vector<8x32xf32>
    %81 = arith.addf %22, %55 : vector<8x32xf32>
    %82 = arith.addf %22, %80 : vector<8x32xf32>
    %83 = vector.extract_strided_slice %14 {offsets = [8, 0], sizes = [8, 128], strides = [1, 1]} : vector<64x128xf32> to vector<8x128xf32>
    %84 = arith.truncf %55 : vector<8x32xf32> to vector<8x32xbf16>
    %cst_29 = arith.constant dense<0.000000e+00> : vector<8x128xf32>
    %85 = tpu.matmul %84, %20, %cst_29 {dimension_numbers = #tpu.dot_dimension_numbers<[1], [0], [0], [1], [0, 0, 1, 1], [], []>} : vector<8x32xbf16>, vector<32x128xbf16>, vector<8x128xf32> -> vector<8x128xf32>
    %86 = arith.addf %83, %85 : vector<8x128xf32>
    %87 = vector.extract_strided_slice %19 {offsets = [48, 0], sizes = [8, 128], strides = [1, 1]} : vector<64x128xf32> to vector<8x128xf32>
    %88 = arith.truncf %80 : vector<8x32xf32> to vector<8x32xbf16>
    %cst_30 = arith.constant dense<0.000000e+00> : vector<8x128xf32>
    %89 = tpu.matmul %88, %21, %cst_30 {dimension_numbers = #tpu.dot_dimension_numbers<[1], [0], [0], [1], [0, 0, 1, 1], [], []>} : vector<8x32xbf16>, vector<32x128xbf16>, vector<8x128xf32> -> vector<8x128xf32>
    %90 = arith.addf %87, %89 : vector<8x128xf32>
    %91 = vector.extract_strided_slice %86 {offsets = [0, 0], sizes = [8, 32], strides = [1, 1]} : vector<8x128xf32> to vector<8x32xf32>
    %92 = arith.negf %91 : vector<8x32xf32>
    %93 = math.exp %92 : vector<8x32xf32>
    %cst_31 = arith.constant 1.000000e+00 : f32
    %94 = vector.broadcast %cst_31 : f32 to vector<8x32xf32>
    %95 = arith.addf %94, %93 : vector<8x32xf32>
    %96 = arith.divf %94, %95 : vector<8x32xf32>
    %97 = vector.extract_strided_slice %86 {offsets = [0, 32], sizes = [8, 32], strides = [1, 1]} : vector<8x128xf32> to vector<8x32xf32>
    %98 = arith.negf %97 : vector<8x32xf32>
    %99 = math.exp %98 : vector<8x32xf32>
    %cst_32 = arith.constant 1.000000e+00 : f32
    %100 = vector.broadcast %cst_32 : f32 to vector<8x32xf32>
    %101 = arith.addf %100, %99 : vector<8x32xf32>
    %102 = arith.divf %100, %101 : vector<8x32xf32>
    %103 = vector.extract_strided_slice %86 {offsets = [0, 64], sizes = [8, 32], strides = [1, 1]} : vector<8x128xf32> to vector<8x32xf32>
    %104 = math.tanh %103 : vector<8x32xf32>
    %105 = vector.extract_strided_slice %86 {offsets = [0, 96], sizes = [8, 32], strides = [1, 1]} : vector<8x128xf32> to vector<8x32xf32>
    %106 = arith.negf %105 : vector<8x32xf32>
    %107 = math.exp %106 : vector<8x32xf32>
    %cst_33 = arith.constant 1.000000e+00 : f32
    %108 = vector.broadcast %cst_33 : f32 to vector<8x32xf32>
    %109 = arith.addf %108, %107 : vector<8x32xf32>
    %110 = arith.divf %108, %109 : vector<8x32xf32>
    %111 = arith.mulf %102, %53 : vector<8x32xf32>
    %112 = arith.mulf %96, %104 : vector<8x32xf32>
    %113 = arith.addf %111, %112 : vector<8x32xf32>
    %114 = math.tanh %113 : vector<8x32xf32>
    %115 = arith.mulf %110, %114 : vector<8x32xf32>
    %116 = vector.extract_strided_slice %90 {offsets = [0, 0], sizes = [8, 32], strides = [1, 1]} : vector<8x128xf32> to vector<8x32xf32>
    %117 = arith.negf %116 : vector<8x32xf32>
    %118 = math.exp %117 : vector<8x32xf32>
    %cst_34 = arith.constant 1.000000e+00 : f32
    %119 = vector.broadcast %cst_34 : f32 to vector<8x32xf32>
    %120 = arith.addf %119, %118 : vector<8x32xf32>
    %121 = arith.divf %119, %120 : vector<8x32xf32>
    %122 = vector.extract_strided_slice %90 {offsets = [0, 32], sizes = [8, 32], strides = [1, 1]} : vector<8x128xf32> to vector<8x32xf32>
    %123 = arith.negf %122 : vector<8x32xf32>
    %124 = math.exp %123 : vector<8x32xf32>
    %cst_35 = arith.constant 1.000000e+00 : f32
    %125 = vector.broadcast %cst_35 : f32 to vector<8x32xf32>
    %126 = arith.addf %125, %124 : vector<8x32xf32>
    %127 = arith.divf %125, %126 : vector<8x32xf32>
    %128 = vector.extract_strided_slice %90 {offsets = [0, 64], sizes = [8, 32], strides = [1, 1]} : vector<8x128xf32> to vector<8x32xf32>
    %129 = math.tanh %128 : vector<8x32xf32>
    %130 = vector.extract_strided_slice %90 {offsets = [0, 96], sizes = [8, 32], strides = [1, 1]} : vector<8x128xf32> to vector<8x32xf32>
    %131 = arith.negf %130 : vector<8x32xf32>
    %132 = math.exp %131 : vector<8x32xf32>
    %cst_36 = arith.constant 1.000000e+00 : f32
    %133 = vector.broadcast %cst_36 : f32 to vector<8x32xf32>
    %134 = arith.addf %133, %132 : vector<8x32xf32>
    %135 = arith.divf %133, %134 : vector<8x32xf32>
    %136 = arith.mulf %127, %78 : vector<8x32xf32>
    %137 = arith.mulf %121, %129 : vector<8x32xf32>
    %138 = arith.addf %136, %137 : vector<8x32xf32>
    %139 = math.tanh %138 : vector<8x32xf32>
    %140 = arith.mulf %135, %139 : vector<8x32xf32>
    %141 = arith.addf %81, %115 : vector<8x32xf32>
    %142 = arith.addf %82, %140 : vector<8x32xf32>
    %143 = vector.extract_strided_slice %14 {offsets = [16, 0], sizes = [8, 128], strides = [1, 1]} : vector<64x128xf32> to vector<8x128xf32>
    %144 = arith.truncf %115 : vector<8x32xf32> to vector<8x32xbf16>
    %cst_37 = arith.constant dense<0.000000e+00> : vector<8x128xf32>
    %145 = tpu.matmul %144, %20, %cst_37 {dimension_numbers = #tpu.dot_dimension_numbers<[1], [0], [0], [1], [0, 0, 1, 1], [], []>} : vector<8x32xbf16>, vector<32x128xbf16>, vector<8x128xf32> -> vector<8x128xf32>
    %146 = arith.addf %143, %145 : vector<8x128xf32>
    %147 = vector.extract_strided_slice %19 {offsets = [40, 0], sizes = [8, 128], strides = [1, 1]} : vector<64x128xf32> to vector<8x128xf32>
    %148 = arith.truncf %140 : vector<8x32xf32> to vector<8x32xbf16>
    %cst_38 = arith.constant dense<0.000000e+00> : vector<8x128xf32>
    %149 = tpu.matmul %148, %21, %cst_38 {dimension_numbers = #tpu.dot_dimension_numbers<[1], [0], [0], [1], [0, 0, 1, 1], [], []>} : vector<8x32xbf16>, vector<32x128xbf16>, vector<8x128xf32> -> vector<8x128xf32>
    %150 = arith.addf %147, %149 : vector<8x128xf32>
    %151 = vector.extract_strided_slice %146 {offsets = [0, 0], sizes = [8, 32], strides = [1, 1]} : vector<8x128xf32> to vector<8x32xf32>
    %152 = arith.negf %151 : vector<8x32xf32>
    %153 = math.exp %152 : vector<8x32xf32>
    %cst_39 = arith.constant 1.000000e+00 : f32
    %154 = vector.broadcast %cst_39 : f32 to vector<8x32xf32>
    %155 = arith.addf %154, %153 : vector<8x32xf32>
    %156 = arith.divf %154, %155 : vector<8x32xf32>
    %157 = vector.extract_strided_slice %146 {offsets = [0, 32], sizes = [8, 32], strides = [1, 1]} : vector<8x128xf32> to vector<8x32xf32>
    %158 = arith.negf %157 : vector<8x32xf32>
    %159 = math.exp %158 : vector<8x32xf32>
    %cst_40 = arith.constant 1.000000e+00 : f32
    %160 = vector.broadcast %cst_40 : f32 to vector<8x32xf32>
    %161 = arith.addf %160, %159 : vector<8x32xf32>
    %162 = arith.divf %160, %161 : vector<8x32xf32>
    %163 = vector.extract_strided_slice %146 {offsets = [0, 64], sizes = [8, 32], strides = [1, 1]} : vector<8x128xf32> to vector<8x32xf32>
    %164 = math.tanh %163 : vector<8x32xf32>
    %165 = vector.extract_strided_slice %146 {offsets = [0, 96], sizes = [8, 32], strides = [1, 1]} : vector<8x128xf32> to vector<8x32xf32>
    %166 = arith.negf %165 : vector<8x32xf32>
    %167 = math.exp %166 : vector<8x32xf32>
    %cst_41 = arith.constant 1.000000e+00 : f32
    %168 = vector.broadcast %cst_41 : f32 to vector<8x32xf32>
    %169 = arith.addf %168, %167 : vector<8x32xf32>
    %170 = arith.divf %168, %169 : vector<8x32xf32>
    %171 = arith.mulf %162, %113 : vector<8x32xf32>
    %172 = arith.mulf %156, %164 : vector<8x32xf32>
    %173 = arith.addf %171, %172 : vector<8x32xf32>
    %174 = math.tanh %173 : vector<8x32xf32>
    %175 = arith.mulf %170, %174 : vector<8x32xf32>
    %176 = vector.extract_strided_slice %150 {offsets = [0, 0], sizes = [8, 32], strides = [1, 1]} : vector<8x128xf32> to vector<8x32xf32>
    %177 = arith.negf %176 : vector<8x32xf32>
    %178 = math.exp %177 : vector<8x32xf32>
    %cst_42 = arith.constant 1.000000e+00 : f32
    %179 = vector.broadcast %cst_42 : f32 to vector<8x32xf32>
    %180 = arith.addf %179, %178 : vector<8x32xf32>
    %181 = arith.divf %179, %180 : vector<8x32xf32>
    %182 = vector.extract_strided_slice %150 {offsets = [0, 32], sizes = [8, 32], strides = [1, 1]} : vector<8x128xf32> to vector<8x32xf32>
    %183 = arith.negf %182 : vector<8x32xf32>
    %184 = math.exp %183 : vector<8x32xf32>
    %cst_43 = arith.constant 1.000000e+00 : f32
    %185 = vector.broadcast %cst_43 : f32 to vector<8x32xf32>
    %186 = arith.addf %185, %184 : vector<8x32xf32>
    %187 = arith.divf %185, %186 : vector<8x32xf32>
    %188 = vector.extract_strided_slice %150 {offsets = [0, 64], sizes = [8, 32], strides = [1, 1]} : vector<8x128xf32> to vector<8x32xf32>
    %189 = math.tanh %188 : vector<8x32xf32>
    %190 = vector.extract_strided_slice %150 {offsets = [0, 96], sizes = [8, 32], strides = [1, 1]} : vector<8x128xf32> to vector<8x32xf32>
    %191 = arith.negf %190 : vector<8x32xf32>
    %192 = math.exp %191 : vector<8x32xf32>
    %cst_44 = arith.constant 1.000000e+00 : f32
    %193 = vector.broadcast %cst_44 : f32 to vector<8x32xf32>
    %194 = arith.addf %193, %192 : vector<8x32xf32>
    %195 = arith.divf %193, %194 : vector<8x32xf32>
    %196 = arith.mulf %187, %138 : vector<8x32xf32>
    %197 = arith.mulf %181, %189 : vector<8x32xf32>
    %198 = arith.addf %196, %197 : vector<8x32xf32>
    %199 = math.tanh %198 : vector<8x32xf32>
    %200 = arith.mulf %195, %199 : vector<8x32xf32>
    %201 = arith.addf %141, %175 : vector<8x32xf32>
    %202 = arith.addf %142, %200 : vector<8x32xf32>
    %203 = vector.extract_strided_slice %14 {offsets = [24, 0], sizes = [8, 128], strides = [1, 1]} : vector<64x128xf32> to vector<8x128xf32>
    %204 = arith.truncf %175 : vector<8x32xf32> to vector<8x32xbf16>
    %cst_45 = arith.constant dense<0.000000e+00> : vector<8x128xf32>
    %205 = tpu.matmul %204, %20, %cst_45 {dimension_numbers = #tpu.dot_dimension_numbers<[1], [0], [0], [1], [0, 0, 1, 1], [], []>} : vector<8x32xbf16>, vector<32x128xbf16>, vector<8x128xf32> -> vector<8x128xf32>
    %206 = arith.addf %203, %205 : vector<8x128xf32>
    %207 = vector.extract_strided_slice %19 {offsets = [32, 0], sizes = [8, 128], strides = [1, 1]} : vector<64x128xf32> to vector<8x128xf32>
    %208 = arith.truncf %200 : vector<8x32xf32> to vector<8x32xbf16>
    %cst_46 = arith.constant dense<0.000000e+00> : vector<8x128xf32>
    %209 = tpu.matmul %208, %21, %cst_46 {dimension_numbers = #tpu.dot_dimension_numbers<[1], [0], [0], [1], [0, 0, 1, 1], [], []>} : vector<8x32xbf16>, vector<32x128xbf16>, vector<8x128xf32> -> vector<8x128xf32>
    %210 = arith.addf %207, %209 : vector<8x128xf32>
    %211 = vector.extract_strided_slice %206 {offsets = [0, 0], sizes = [8, 32], strides = [1, 1]} : vector<8x128xf32> to vector<8x32xf32>
    %212 = arith.negf %211 : vector<8x32xf32>
    %213 = math.exp %212 : vector<8x32xf32>
    %cst_47 = arith.constant 1.000000e+00 : f32
    %214 = vector.broadcast %cst_47 : f32 to vector<8x32xf32>
    %215 = arith.addf %214, %213 : vector<8x32xf32>
    %216 = arith.divf %214, %215 : vector<8x32xf32>
    %217 = vector.extract_strided_slice %206 {offsets = [0, 32], sizes = [8, 32], strides = [1, 1]} : vector<8x128xf32> to vector<8x32xf32>
    %218 = arith.negf %217 : vector<8x32xf32>
    %219 = math.exp %218 : vector<8x32xf32>
    %cst_48 = arith.constant 1.000000e+00 : f32
    %220 = vector.broadcast %cst_48 : f32 to vector<8x32xf32>
    %221 = arith.addf %220, %219 : vector<8x32xf32>
    %222 = arith.divf %220, %221 : vector<8x32xf32>
    %223 = vector.extract_strided_slice %206 {offsets = [0, 64], sizes = [8, 32], strides = [1, 1]} : vector<8x128xf32> to vector<8x32xf32>
    %224 = math.tanh %223 : vector<8x32xf32>
    %225 = vector.extract_strided_slice %206 {offsets = [0, 96], sizes = [8, 32], strides = [1, 1]} : vector<8x128xf32> to vector<8x32xf32>
    %226 = arith.negf %225 : vector<8x32xf32>
    %227 = math.exp %226 : vector<8x32xf32>
    %cst_49 = arith.constant 1.000000e+00 : f32
    %228 = vector.broadcast %cst_49 : f32 to vector<8x32xf32>
    %229 = arith.addf %228, %227 : vector<8x32xf32>
    %230 = arith.divf %228, %229 : vector<8x32xf32>
    %231 = arith.mulf %222, %173 : vector<8x32xf32>
    %232 = arith.mulf %216, %224 : vector<8x32xf32>
    %233 = arith.addf %231, %232 : vector<8x32xf32>
    %234 = math.tanh %233 : vector<8x32xf32>
    %235 = arith.mulf %230, %234 : vector<8x32xf32>
    %236 = vector.extract_strided_slice %210 {offsets = [0, 0], sizes = [8, 32], strides = [1, 1]} : vector<8x128xf32> to vector<8x32xf32>
    %237 = arith.negf %236 : vector<8x32xf32>
    %238 = math.exp %237 : vector<8x32xf32>
    %cst_50 = arith.constant 1.000000e+00 : f32
    %239 = vector.broadcast %cst_50 : f32 to vector<8x32xf32>
    %240 = arith.addf %239, %238 : vector<8x32xf32>
    %241 = arith.divf %239, %240 : vector<8x32xf32>
    %242 = vector.extract_strided_slice %210 {offsets = [0, 32], sizes = [8, 32], strides = [1, 1]} : vector<8x128xf32> to vector<8x32xf32>
    %243 = arith.negf %242 : vector<8x32xf32>
    %244 = math.exp %243 : vector<8x32xf32>
    %cst_51 = arith.constant 1.000000e+00 : f32
    %245 = vector.broadcast %cst_51 : f32 to vector<8x32xf32>
    %246 = arith.addf %245, %244 : vector<8x32xf32>
    %247 = arith.divf %245, %246 : vector<8x32xf32>
    %248 = vector.extract_strided_slice %210 {offsets = [0, 64], sizes = [8, 32], strides = [1, 1]} : vector<8x128xf32> to vector<8x32xf32>
    %249 = math.tanh %248 : vector<8x32xf32>
    %250 = vector.extract_strided_slice %210 {offsets = [0, 96], sizes = [8, 32], strides = [1, 1]} : vector<8x128xf32> to vector<8x32xf32>
    %251 = arith.negf %250 : vector<8x32xf32>
    %252 = math.exp %251 : vector<8x32xf32>
    %cst_52 = arith.constant 1.000000e+00 : f32
    %253 = vector.broadcast %cst_52 : f32 to vector<8x32xf32>
    %254 = arith.addf %253, %252 : vector<8x32xf32>
    %255 = arith.divf %253, %254 : vector<8x32xf32>
    %256 = arith.mulf %247, %198 : vector<8x32xf32>
    %257 = arith.mulf %241, %249 : vector<8x32xf32>
    %258 = arith.addf %256, %257 : vector<8x32xf32>
    %259 = math.tanh %258 : vector<8x32xf32>
    %260 = arith.mulf %255, %259 : vector<8x32xf32>
    %261 = arith.addf %201, %235 : vector<8x32xf32>
    %262 = arith.addf %202, %260 : vector<8x32xf32>
    %263 = vector.extract_strided_slice %14 {offsets = [32, 0], sizes = [8, 128], strides = [1, 1]} : vector<64x128xf32> to vector<8x128xf32>
    %264 = arith.truncf %235 : vector<8x32xf32> to vector<8x32xbf16>
    %cst_53 = arith.constant dense<0.000000e+00> : vector<8x128xf32>
    %265 = tpu.matmul %264, %20, %cst_53 {dimension_numbers = #tpu.dot_dimension_numbers<[1], [0], [0], [1], [0, 0, 1, 1], [], []>} : vector<8x32xbf16>, vector<32x128xbf16>, vector<8x128xf32> -> vector<8x128xf32>
    %266 = arith.addf %263, %265 : vector<8x128xf32>
    %267 = vector.extract_strided_slice %19 {offsets = [24, 0], sizes = [8, 128], strides = [1, 1]} : vector<64x128xf32> to vector<8x128xf32>
    %268 = arith.truncf %260 : vector<8x32xf32> to vector<8x32xbf16>
    %cst_54 = arith.constant dense<0.000000e+00> : vector<8x128xf32>
    %269 = tpu.matmul %268, %21, %cst_54 {dimension_numbers = #tpu.dot_dimension_numbers<[1], [0], [0], [1], [0, 0, 1, 1], [], []>} : vector<8x32xbf16>, vector<32x128xbf16>, vector<8x128xf32> -> vector<8x128xf32>
    %270 = arith.addf %267, %269 : vector<8x128xf32>
    %271 = vector.extract_strided_slice %266 {offsets = [0, 0], sizes = [8, 32], strides = [1, 1]} : vector<8x128xf32> to vector<8x32xf32>
    %272 = arith.negf %271 : vector<8x32xf32>
    %273 = math.exp %272 : vector<8x32xf32>
    %cst_55 = arith.constant 1.000000e+00 : f32
    %274 = vector.broadcast %cst_55 : f32 to vector<8x32xf32>
    %275 = arith.addf %274, %273 : vector<8x32xf32>
    %276 = arith.divf %274, %275 : vector<8x32xf32>
    %277 = vector.extract_strided_slice %266 {offsets = [0, 32], sizes = [8, 32], strides = [1, 1]} : vector<8x128xf32> to vector<8x32xf32>
    %278 = arith.negf %277 : vector<8x32xf32>
    %279 = math.exp %278 : vector<8x32xf32>
    %cst_56 = arith.constant 1.000000e+00 : f32
    %280 = vector.broadcast %cst_56 : f32 to vector<8x32xf32>
    %281 = arith.addf %280, %279 : vector<8x32xf32>
    %282 = arith.divf %280, %281 : vector<8x32xf32>
    %283 = vector.extract_strided_slice %266 {offsets = [0, 64], sizes = [8, 32], strides = [1, 1]} : vector<8x128xf32> to vector<8x32xf32>
    %284 = math.tanh %283 : vector<8x32xf32>
    %285 = vector.extract_strided_slice %266 {offsets = [0, 96], sizes = [8, 32], strides = [1, 1]} : vector<8x128xf32> to vector<8x32xf32>
    %286 = arith.negf %285 : vector<8x32xf32>
    %287 = math.exp %286 : vector<8x32xf32>
    %cst_57 = arith.constant 1.000000e+00 : f32
    %288 = vector.broadcast %cst_57 : f32 to vector<8x32xf32>
    %289 = arith.addf %288, %287 : vector<8x32xf32>
    %290 = arith.divf %288, %289 : vector<8x32xf32>
    %291 = arith.mulf %282, %233 : vector<8x32xf32>
    %292 = arith.mulf %276, %284 : vector<8x32xf32>
    %293 = arith.addf %291, %292 : vector<8x32xf32>
    %294 = math.tanh %293 : vector<8x32xf32>
    %295 = arith.mulf %290, %294 : vector<8x32xf32>
    %296 = vector.extract_strided_slice %270 {offsets = [0, 0], sizes = [8, 32], strides = [1, 1]} : vector<8x128xf32> to vector<8x32xf32>
    %297 = arith.negf %296 : vector<8x32xf32>
    %298 = math.exp %297 : vector<8x32xf32>
    %cst_58 = arith.constant 1.000000e+00 : f32
    %299 = vector.broadcast %cst_58 : f32 to vector<8x32xf32>
    %300 = arith.addf %299, %298 : vector<8x32xf32>
    %301 = arith.divf %299, %300 : vector<8x32xf32>
    %302 = vector.extract_strided_slice %270 {offsets = [0, 32], sizes = [8, 32], strides = [1, 1]} : vector<8x128xf32> to vector<8x32xf32>
    %303 = arith.negf %302 : vector<8x32xf32>
    %304 = math.exp %303 : vector<8x32xf32>
    %cst_59 = arith.constant 1.000000e+00 : f32
    %305 = vector.broadcast %cst_59 : f32 to vector<8x32xf32>
    %306 = arith.addf %305, %304 : vector<8x32xf32>
    %307 = arith.divf %305, %306 : vector<8x32xf32>
    %308 = vector.extract_strided_slice %270 {offsets = [0, 64], sizes = [8, 32], strides = [1, 1]} : vector<8x128xf32> to vector<8x32xf32>
    %309 = math.tanh %308 : vector<8x32xf32>
    %310 = vector.extract_strided_slice %270 {offsets = [0, 96], sizes = [8, 32], strides = [1, 1]} : vector<8x128xf32> to vector<8x32xf32>
    %311 = arith.negf %310 : vector<8x32xf32>
    %312 = math.exp %311 : vector<8x32xf32>
    %cst_60 = arith.constant 1.000000e+00 : f32
    %313 = vector.broadcast %cst_60 : f32 to vector<8x32xf32>
    %314 = arith.addf %313, %312 : vector<8x32xf32>
    %315 = arith.divf %313, %314 : vector<8x32xf32>
    %316 = arith.mulf %307, %258 : vector<8x32xf32>
    %317 = arith.mulf %301, %309 : vector<8x32xf32>
    %318 = arith.addf %316, %317 : vector<8x32xf32>
    %319 = math.tanh %318 : vector<8x32xf32>
    %320 = arith.mulf %315, %319 : vector<8x32xf32>
    %321 = arith.addf %261, %295 : vector<8x32xf32>
    %322 = arith.addf %262, %320 : vector<8x32xf32>
    %323 = vector.extract_strided_slice %14 {offsets = [40, 0], sizes = [8, 128], strides = [1, 1]} : vector<64x128xf32> to vector<8x128xf32>
    %324 = arith.truncf %295 : vector<8x32xf32> to vector<8x32xbf16>
    %cst_61 = arith.constant dense<0.000000e+00> : vector<8x128xf32>
    %325 = tpu.matmul %324, %20, %cst_61 {dimension_numbers = #tpu.dot_dimension_numbers<[1], [0], [0], [1], [0, 0, 1, 1], [], []>} : vector<8x32xbf16>, vector<32x128xbf16>, vector<8x128xf32> -> vector<8x128xf32>
    %326 = arith.addf %323, %325 : vector<8x128xf32>
    %327 = vector.extract_strided_slice %19 {offsets = [16, 0], sizes = [8, 128], strides = [1, 1]} : vector<64x128xf32> to vector<8x128xf32>
    %328 = arith.truncf %320 : vector<8x32xf32> to vector<8x32xbf16>
    %cst_62 = arith.constant dense<0.000000e+00> : vector<8x128xf32>
    %329 = tpu.matmul %328, %21, %cst_62 {dimension_numbers = #tpu.dot_dimension_numbers<[1], [0], [0], [1], [0, 0, 1, 1], [], []>} : vector<8x32xbf16>, vector<32x128xbf16>, vector<8x128xf32> -> vector<8x128xf32>
    %330 = arith.addf %327, %329 : vector<8x128xf32>
    %331 = vector.extract_strided_slice %326 {offsets = [0, 0], sizes = [8, 32], strides = [1, 1]} : vector<8x128xf32> to vector<8x32xf32>
    %332 = arith.negf %331 : vector<8x32xf32>
    %333 = math.exp %332 : vector<8x32xf32>
    %cst_63 = arith.constant 1.000000e+00 : f32
    %334 = vector.broadcast %cst_63 : f32 to vector<8x32xf32>
    %335 = arith.addf %334, %333 : vector<8x32xf32>
    %336 = arith.divf %334, %335 : vector<8x32xf32>
    %337 = vector.extract_strided_slice %326 {offsets = [0, 32], sizes = [8, 32], strides = [1, 1]} : vector<8x128xf32> to vector<8x32xf32>
    %338 = arith.negf %337 : vector<8x32xf32>
    %339 = math.exp %338 : vector<8x32xf32>
    %cst_64 = arith.constant 1.000000e+00 : f32
    %340 = vector.broadcast %cst_64 : f32 to vector<8x32xf32>
    %341 = arith.addf %340, %339 : vector<8x32xf32>
    %342 = arith.divf %340, %341 : vector<8x32xf32>
    %343 = vector.extract_strided_slice %326 {offsets = [0, 64], sizes = [8, 32], strides = [1, 1]} : vector<8x128xf32> to vector<8x32xf32>
    %344 = math.tanh %343 : vector<8x32xf32>
    %345 = vector.extract_strided_slice %326 {offsets = [0, 96], sizes = [8, 32], strides = [1, 1]} : vector<8x128xf32> to vector<8x32xf32>
    %346 = arith.negf %345 : vector<8x32xf32>
    %347 = math.exp %346 : vector<8x32xf32>
    %cst_65 = arith.constant 1.000000e+00 : f32
    %348 = vector.broadcast %cst_65 : f32 to vector<8x32xf32>
    %349 = arith.addf %348, %347 : vector<8x32xf32>
    %350 = arith.divf %348, %349 : vector<8x32xf32>
    %351 = arith.mulf %342, %293 : vector<8x32xf32>
    %352 = arith.mulf %336, %344 : vector<8x32xf32>
    %353 = arith.addf %351, %352 : vector<8x32xf32>
    %354 = math.tanh %353 : vector<8x32xf32>
    %355 = arith.mulf %350, %354 : vector<8x32xf32>
    %356 = vector.extract_strided_slice %330 {offsets = [0, 0], sizes = [8, 32], strides = [1, 1]} : vector<8x128xf32> to vector<8x32xf32>
    %357 = arith.negf %356 : vector<8x32xf32>
    %358 = math.exp %357 : vector<8x32xf32>
    %cst_66 = arith.constant 1.000000e+00 : f32
    %359 = vector.broadcast %cst_66 : f32 to vector<8x32xf32>
    %360 = arith.addf %359, %358 : vector<8x32xf32>
    %361 = arith.divf %359, %360 : vector<8x32xf32>
    %362 = vector.extract_strided_slice %330 {offsets = [0, 32], sizes = [8, 32], strides = [1, 1]} : vector<8x128xf32> to vector<8x32xf32>
    %363 = arith.negf %362 : vector<8x32xf32>
    %364 = math.exp %363 : vector<8x32xf32>
    %cst_67 = arith.constant 1.000000e+00 : f32
    %365 = vector.broadcast %cst_67 : f32 to vector<8x32xf32>
    %366 = arith.addf %365, %364 : vector<8x32xf32>
    %367 = arith.divf %365, %366 : vector<8x32xf32>
    %368 = vector.extract_strided_slice %330 {offsets = [0, 64], sizes = [8, 32], strides = [1, 1]} : vector<8x128xf32> to vector<8x32xf32>
    %369 = math.tanh %368 : vector<8x32xf32>
    %370 = vector.extract_strided_slice %330 {offsets = [0, 96], sizes = [8, 32], strides = [1, 1]} : vector<8x128xf32> to vector<8x32xf32>
    %371 = arith.negf %370 : vector<8x32xf32>
    %372 = math.exp %371 : vector<8x32xf32>
    %cst_68 = arith.constant 1.000000e+00 : f32
    %373 = vector.broadcast %cst_68 : f32 to vector<8x32xf32>
    %374 = arith.addf %373, %372 : vector<8x32xf32>
    %375 = arith.divf %373, %374 : vector<8x32xf32>
    %376 = arith.mulf %367, %318 : vector<8x32xf32>
    %377 = arith.mulf %361, %369 : vector<8x32xf32>
    %378 = arith.addf %376, %377 : vector<8x32xf32>
    %379 = math.tanh %378 : vector<8x32xf32>
    %380 = arith.mulf %375, %379 : vector<8x32xf32>
    %381 = arith.addf %321, %355 : vector<8x32xf32>
    %382 = arith.addf %322, %380 : vector<8x32xf32>
    %383 = vector.extract_strided_slice %14 {offsets = [48, 0], sizes = [8, 128], strides = [1, 1]} : vector<64x128xf32> to vector<8x128xf32>
    %384 = arith.truncf %355 : vector<8x32xf32> to vector<8x32xbf16>
    %cst_69 = arith.constant dense<0.000000e+00> : vector<8x128xf32>
    %385 = tpu.matmul %384, %20, %cst_69 {dimension_numbers = #tpu.dot_dimension_numbers<[1], [0], [0], [1], [0, 0, 1, 1], [], []>} : vector<8x32xbf16>, vector<32x128xbf16>, vector<8x128xf32> -> vector<8x128xf32>
    %386 = arith.addf %383, %385 : vector<8x128xf32>
    %387 = vector.extract_strided_slice %19 {offsets = [8, 0], sizes = [8, 128], strides = [1, 1]} : vector<64x128xf32> to vector<8x128xf32>
    %388 = arith.truncf %380 : vector<8x32xf32> to vector<8x32xbf16>
    %cst_70 = arith.constant dense<0.000000e+00> : vector<8x128xf32>
    %389 = tpu.matmul %388, %21, %cst_70 {dimension_numbers = #tpu.dot_dimension_numbers<[1], [0], [0], [1], [0, 0, 1, 1], [], []>} : vector<8x32xbf16>, vector<32x128xbf16>, vector<8x128xf32> -> vector<8x128xf32>
    %390 = arith.addf %387, %389 : vector<8x128xf32>
    %391 = vector.extract_strided_slice %386 {offsets = [0, 0], sizes = [8, 32], strides = [1, 1]} : vector<8x128xf32> to vector<8x32xf32>
    %392 = arith.negf %391 : vector<8x32xf32>
    %393 = math.exp %392 : vector<8x32xf32>
    %cst_71 = arith.constant 1.000000e+00 : f32
    %394 = vector.broadcast %cst_71 : f32 to vector<8x32xf32>
    %395 = arith.addf %394, %393 : vector<8x32xf32>
    %396 = arith.divf %394, %395 : vector<8x32xf32>
    %397 = vector.extract_strided_slice %386 {offsets = [0, 32], sizes = [8, 32], strides = [1, 1]} : vector<8x128xf32> to vector<8x32xf32>
    %398 = arith.negf %397 : vector<8x32xf32>
    %399 = math.exp %398 : vector<8x32xf32>
    %cst_72 = arith.constant 1.000000e+00 : f32
    %400 = vector.broadcast %cst_72 : f32 to vector<8x32xf32>
    %401 = arith.addf %400, %399 : vector<8x32xf32>
    %402 = arith.divf %400, %401 : vector<8x32xf32>
    %403 = vector.extract_strided_slice %386 {offsets = [0, 64], sizes = [8, 32], strides = [1, 1]} : vector<8x128xf32> to vector<8x32xf32>
    %404 = math.tanh %403 : vector<8x32xf32>
    %405 = vector.extract_strided_slice %386 {offsets = [0, 96], sizes = [8, 32], strides = [1, 1]} : vector<8x128xf32> to vector<8x32xf32>
    %406 = arith.negf %405 : vector<8x32xf32>
    %407 = math.exp %406 : vector<8x32xf32>
    %cst_73 = arith.constant 1.000000e+00 : f32
    %408 = vector.broadcast %cst_73 : f32 to vector<8x32xf32>
    %409 = arith.addf %408, %407 : vector<8x32xf32>
    %410 = arith.divf %408, %409 : vector<8x32xf32>
    %411 = arith.mulf %402, %353 : vector<8x32xf32>
    %412 = arith.mulf %396, %404 : vector<8x32xf32>
    %413 = arith.addf %411, %412 : vector<8x32xf32>
    %414 = math.tanh %413 : vector<8x32xf32>
    %415 = arith.mulf %410, %414 : vector<8x32xf32>
    %416 = vector.extract_strided_slice %390 {offsets = [0, 0], sizes = [8, 32], strides = [1, 1]} : vector<8x128xf32> to vector<8x32xf32>
    %417 = arith.negf %416 : vector<8x32xf32>
    %418 = math.exp %417 : vector<8x32xf32>
    %cst_74 = arith.constant 1.000000e+00 : f32
    %419 = vector.broadcast %cst_74 : f32 to vector<8x32xf32>
    %420 = arith.addf %419, %418 : vector<8x32xf32>
    %421 = arith.divf %419, %420 : vector<8x32xf32>
    %422 = vector.extract_strided_slice %390 {offsets = [0, 32], sizes = [8, 32], strides = [1, 1]} : vector<8x128xf32> to vector<8x32xf32>
    %423 = arith.negf %422 : vector<8x32xf32>
    %424 = math.exp %423 : vector<8x32xf32>
    %cst_75 = arith.constant 1.000000e+00 : f32
    %425 = vector.broadcast %cst_75 : f32 to vector<8x32xf32>
    %426 = arith.addf %425, %424 : vector<8x32xf32>
    %427 = arith.divf %425, %426 : vector<8x32xf32>
    %428 = vector.extract_strided_slice %390 {offsets = [0, 64], sizes = [8, 32], strides = [1, 1]} : vector<8x128xf32> to vector<8x32xf32>
    %429 = math.tanh %428 : vector<8x32xf32>
    %430 = vector.extract_strided_slice %390 {offsets = [0, 96], sizes = [8, 32], strides = [1, 1]} : vector<8x128xf32> to vector<8x32xf32>
    %431 = arith.negf %430 : vector<8x32xf32>
    %432 = math.exp %431 : vector<8x32xf32>
    %cst_76 = arith.constant 1.000000e+00 : f32
    %433 = vector.broadcast %cst_76 : f32 to vector<8x32xf32>
    %434 = arith.addf %433, %432 : vector<8x32xf32>
    %435 = arith.divf %433, %434 : vector<8x32xf32>
    %436 = arith.mulf %427, %378 : vector<8x32xf32>
    %437 = arith.mulf %421, %429 : vector<8x32xf32>
    %438 = arith.addf %436, %437 : vector<8x32xf32>
    %439 = math.tanh %438 : vector<8x32xf32>
    %440 = arith.mulf %435, %439 : vector<8x32xf32>
    %441 = arith.addf %381, %415 : vector<8x32xf32>
    %442 = arith.addf %382, %440 : vector<8x32xf32>
    %443 = vector.extract_strided_slice %14 {offsets = [56, 0], sizes = [8, 128], strides = [1, 1]} : vector<64x128xf32> to vector<8x128xf32>
    %444 = arith.truncf %415 : vector<8x32xf32> to vector<8x32xbf16>
    %cst_77 = arith.constant dense<0.000000e+00> : vector<8x128xf32>
    %445 = tpu.matmul %444, %20, %cst_77 {dimension_numbers = #tpu.dot_dimension_numbers<[1], [0], [0], [1], [0, 0, 1, 1], [], []>} : vector<8x32xbf16>, vector<32x128xbf16>, vector<8x128xf32> -> vector<8x128xf32>
    %446 = arith.addf %443, %445 : vector<8x128xf32>
    %447 = vector.extract_strided_slice %19 {offsets = [0, 0], sizes = [8, 128], strides = [1, 1]} : vector<64x128xf32> to vector<8x128xf32>
    %448 = arith.truncf %440 : vector<8x32xf32> to vector<8x32xbf16>
    %cst_78 = arith.constant dense<0.000000e+00> : vector<8x128xf32>
    %449 = tpu.matmul %448, %21, %cst_78 {dimension_numbers = #tpu.dot_dimension_numbers<[1], [0], [0], [1], [0, 0, 1, 1], [], []>} : vector<8x32xbf16>, vector<32x128xbf16>, vector<8x128xf32> -> vector<8x128xf32>
    %450 = arith.addf %447, %449 : vector<8x128xf32>
    %451 = vector.extract_strided_slice %446 {offsets = [0, 0], sizes = [8, 32], strides = [1, 1]} : vector<8x128xf32> to vector<8x32xf32>
    %452 = arith.negf %451 : vector<8x32xf32>
    %453 = math.exp %452 : vector<8x32xf32>
    %cst_79 = arith.constant 1.000000e+00 : f32
    %454 = vector.broadcast %cst_79 : f32 to vector<8x32xf32>
    %455 = arith.addf %454, %453 : vector<8x32xf32>
    %456 = arith.divf %454, %455 : vector<8x32xf32>
    %457 = vector.extract_strided_slice %446 {offsets = [0, 32], sizes = [8, 32], strides = [1, 1]} : vector<8x128xf32> to vector<8x32xf32>
    %458 = arith.negf %457 : vector<8x32xf32>
    %459 = math.exp %458 : vector<8x32xf32>
    %cst_80 = arith.constant 1.000000e+00 : f32
    %460 = vector.broadcast %cst_80 : f32 to vector<8x32xf32>
    %461 = arith.addf %460, %459 : vector<8x32xf32>
    %462 = arith.divf %460, %461 : vector<8x32xf32>
    %463 = vector.extract_strided_slice %446 {offsets = [0, 64], sizes = [8, 32], strides = [1, 1]} : vector<8x128xf32> to vector<8x32xf32>
    %464 = math.tanh %463 : vector<8x32xf32>
    %465 = vector.extract_strided_slice %446 {offsets = [0, 96], sizes = [8, 32], strides = [1, 1]} : vector<8x128xf32> to vector<8x32xf32>
    %466 = arith.negf %465 : vector<8x32xf32>
    %467 = math.exp %466 : vector<8x32xf32>
    %cst_81 = arith.constant 1.000000e+00 : f32
    %468 = vector.broadcast %cst_81 : f32 to vector<8x32xf32>
    %469 = arith.addf %468, %467 : vector<8x32xf32>
    %470 = arith.divf %468, %469 : vector<8x32xf32>
    %471 = arith.mulf %462, %413 : vector<8x32xf32>
    %472 = arith.mulf %456, %464 : vector<8x32xf32>
    %473 = arith.addf %471, %472 : vector<8x32xf32>
    %474 = math.tanh %473 : vector<8x32xf32>
    %475 = arith.mulf %470, %474 : vector<8x32xf32>
    %476 = vector.extract_strided_slice %450 {offsets = [0, 0], sizes = [8, 32], strides = [1, 1]} : vector<8x128xf32> to vector<8x32xf32>
    %477 = arith.negf %476 : vector<8x32xf32>
    %478 = math.exp %477 : vector<8x32xf32>
    %cst_82 = arith.constant 1.000000e+00 : f32
    %479 = vector.broadcast %cst_82 : f32 to vector<8x32xf32>
    %480 = arith.addf %479, %478 : vector<8x32xf32>
    %481 = arith.divf %479, %480 : vector<8x32xf32>
    %482 = vector.extract_strided_slice %450 {offsets = [0, 32], sizes = [8, 32], strides = [1, 1]} : vector<8x128xf32> to vector<8x32xf32>
    %483 = arith.negf %482 : vector<8x32xf32>
    %484 = math.exp %483 : vector<8x32xf32>
    %cst_83 = arith.constant 1.000000e+00 : f32
    %485 = vector.broadcast %cst_83 : f32 to vector<8x32xf32>
    %486 = arith.addf %485, %484 : vector<8x32xf32>
    %487 = arith.divf %485, %486 : vector<8x32xf32>
    %488 = vector.extract_strided_slice %450 {offsets = [0, 64], sizes = [8, 32], strides = [1, 1]} : vector<8x128xf32> to vector<8x32xf32>
    %489 = math.tanh %488 : vector<8x32xf32>
    %490 = vector.extract_strided_slice %450 {offsets = [0, 96], sizes = [8, 32], strides = [1, 1]} : vector<8x128xf32> to vector<8x32xf32>
    %491 = arith.negf %490 : vector<8x32xf32>
    %492 = math.exp %491 : vector<8x32xf32>
    %cst_84 = arith.constant 1.000000e+00 : f32
    %493 = vector.broadcast %cst_84 : f32 to vector<8x32xf32>
    %494 = arith.addf %493, %492 : vector<8x32xf32>
    %495 = arith.divf %493, %494 : vector<8x32xf32>
    %496 = arith.mulf %487, %438 : vector<8x32xf32>
    %497 = arith.mulf %481, %489 : vector<8x32xf32>
    %498 = arith.addf %496, %497 : vector<8x32xf32>
    %499 = math.tanh %498 : vector<8x32xf32>
    %500 = arith.mulf %495, %499 : vector<8x32xf32>
    %501 = arith.addf %441, %475 : vector<8x32xf32>
    %502 = arith.addf %442, %500 : vector<8x32xf32>
    %503 = vector.extract_strided_slice %501 {offsets = [0, 0], sizes = [4, 32], strides = [1, 1]} : vector<8x32xf32> to vector<4x32xf32>
    %c0_85 = arith.constant 0 : index
    %c0_86 = arith.constant 0 : index
    %504 = vector.load %arg10[%c0_85, %c0_86] : memref<4x128xf32, #tpu.memory_space<vmem>>, vector<4x32xf32>
    tpu.vector_store %arg10[%c0_85, %c0_86], %503 {strides = array<i32>} : memref<4x128xf32, #tpu.memory_space<vmem>>, vector<4x32xf32>,
    %505 = vector.extract_strided_slice %502 {offsets = [0, 0], sizes = [4, 32], strides = [1, 1]} : vector<8x32xf32> to vector<4x32xf32>
    %c0_87 = arith.constant 0 : index
    %c32 = arith.constant 32 : index
    %506 = vector.load %arg10[%c0_87, %c32] : memref<4x128xf32, #tpu.memory_space<vmem>>, vector<4x32xf32>
    tpu.vector_store %arg10[%c0_87, %c32], %505 {strides = array<i32>} : memref<4x128xf32, #tpu.memory_space<vmem>>, vector<4x32xf32>,
    %507 = vector.extract_strided_slice %501 {offsets = [4, 0], sizes = [4, 32], strides = [1, 1]} : vector<8x32xf32> to vector<4x32xf32>
    %c0_88 = arith.constant 0 : index
    %c64 = arith.constant 64 : index
    %508 = vector.load %arg10[%c0_88, %c64] : memref<4x128xf32, #tpu.memory_space<vmem>>, vector<4x32xf32>
    tpu.vector_store %arg10[%c0_88, %c64], %507 {strides = array<i32>} : memref<4x128xf32, #tpu.memory_space<vmem>>, vector<4x32xf32>,
    %509 = vector.extract_strided_slice %502 {offsets = [4, 0], sizes = [4, 32], strides = [1, 1]} : vector<8x32xf32> to vector<4x32xf32>
    %c0_89 = arith.constant 0 : index
    %c96 = arith.constant 96 : index
    %510 = vector.load %arg10[%c0_89, %c96] : memref<4x128xf32, #tpu.memory_space<vmem>>, vector<4x32xf32>
    tpu.vector_store %arg10[%c0_89, %c96], %509 {strides = array<i32>} : memref<4x128xf32, #tpu.memory_space<vmem>>, vector<4x32xf32>,
    return
  }
  func.func @transform_0(%arg0: i32) -> (i32, i32) {
    %c0_i32 = arith.constant 0 : i32
    %c0_i32_0 = arith.constant 0 : i32
    %c0_i32_1 = arith.constant 0 : i32
    return %c0_i32, %c0_i32_0 : i32, i32
  }
  func.func @transform_1(%arg0: i32) -> (i32, i32) {
    %c0_i32 = arith.constant 0 : i32
    %c0_i32_0 = arith.constant 0 : i32
    %c0_i32_1 = arith.constant 0 : i32
    return %c0_i32, %c0_i32_0 : i32, i32
  }
  func.func @transform_2(%arg0: i32) -> (i32, i32) {
    %c0_i32 = arith.constant 0 : i32
    %c0_i32_0 = arith.constant 0 : i32
    %c0_i32_1 = arith.constant 0 : i32
    return %c0_i32, %c0_i32_0 : i32, i32
  }
  func.func @transform_3(%arg0: i32) -> (i32, i32) {
    %c0_i32 = arith.constant 0 : i32
    %c0_i32_0 = arith.constant 0 : i32
    %c0_i32_1 = arith.constant 0 : i32
    return %c0_i32, %c0_i32_0 : i32, i32
  }
  func.func @transform_4(%arg0: i32) -> (i32, i32) {
    %c0_i32 = arith.constant 0 : i32
    %c0_i32_0 = arith.constant 0 : i32
    %c0_i32_1 = arith.constant 0 : i32
    return %c0_i32, %c0_i32_0 : i32, i32
  }
  func.func @transform_5(%arg0: i32) -> (i32, i32) {
    %c0_i32 = arith.constant 0 : i32
    %c0_i32_0 = arith.constant 0 : i32
    %c0_i32_1 = arith.constant 0 : i32
    return %c0_i32, %c0_i32_0 : i32, i32
  }
  func.func @transform_6(%arg0: i32) -> (i32, i32) {
    %c0_i32 = arith.constant 0 : i32
    %c0_i32_0 = arith.constant 0 : i32
    %c0_i32_1 = arith.constant 0 : i32
    return %c0_i32, %c0_i32_0 : i32, i32
  }
  func.func @transform_7(%arg0: i32) -> (i32, i32) {
    %c0_i32 = arith.constant 0 : i32
    %c0_i32_0 = arith.constant 0 : i32
    %c0_i32_1 = arith.constant 0 : i32
    return %c0_i32, %c0_i32_0 : i32, i32
  }
  func.func @transform_8(%arg0: i32) -> (i32, i32) {
    %c0_i32 = arith.constant 0 : i32
    %c0_i32_0 = arith.constant 0 : i32
    %c0_i32_1 = arith.constant 0 : i32
    return %c0_i32, %c0_i32_0 : i32, i32
  }
  func.func @transform_9(%arg0: i32) -> (i32, i32) {
    %c0_i32 = arith.constant 0 : i32
    %c0_i32_0 = arith.constant 0 : i32
    %c0_i32_1 = arith.constant 0 : i32
    return %c0_i32, %c0_i32_0 : i32, i32
  }
}

</mosaic_0001>

<bundles_post_ra>
// kernel: rnn_nli_forward.3
= control target key start
LH: loop header
LB: loop body
LE: loop exit
PB: predicated region body
PF: predicated region fallthrough
CT: control target
= control target key end

     0   :  { %s745_s0 = inlined_call_operand.vmem [shape: f32[4,128], index: 0, kind: input, shape index: {}]   ;;  %s746_s1 = inlined_call_operand.vmem [shape: bf16[3,128,128], index: 1, kind: input, shape index: {}]   ;;  %s747_s2 = inlined_call_operand.vmem [shape: f32[3,1,128], index: 2, kind: input, shape index: {}]   ;;  %s748_s3 = inlined_call_operand.vmem [shape: bf16[128,3], index: 3, kind: input, shape index: {}]   ;;  %s749_s4 = inlined_call_operand.vmem [shape: f32[1,3], index: 4, kind: input, shape index: {}]   ;;  %s750_s5 = inlined_call_operand.hbm [shape: f32[4,3], index: 5, kind: output, shape index: {}]  }
   0x1   :  { %v544_v0 = vld [vmem:[%s746_s1 + $0x38] sm:$0xff]  ;;  %v543_v1 = vld [vmem:[%s746_s1 + $0x30] sm:$0xff]  ;;  %v542_v3 = vld [vmem:[%s746_s1 + $0x28] sm:$0xff] }
   0x2   :  { %91 = vmatpush.bf16.msra.mxu0 %v544_v0  ;;  %v552_v2 = vld [vmem:[%s746_s1 + $0x78] sm:$0xff]  ;;  %v551_v4 = vld [vmem:[%s746_s1 + $0x70] sm:$0xff] }
   0x3   :  { %176 = vmatpush.bf16.msra.mxu1 %v552_v2 }
   0x6   :  { %92 = vmatpush.bf16.msra.mxu0 %v543_v1 }
   0x7   :  { %10 = vsyncpa [#allocation3], 0  ;;  %177 = vmatpush.bf16.msra.mxu1 %v551_v4  ;;  %v550_v5 = vld [vmem:[%s746_s1 + $0x68] sm:$0xff]  ;;  %v541_v6 = vld [vmem:[%s746_s1 + $0x20] sm:$0xff]  ;;  %s600_s14 = smov [#allocation2]   ;;  %vm357_vm0 = vcmask 19456  }
   0x8   :  { %v549_v7 = vld [vmem:[%s746_s1 + $0x60] sm:$0xff]  ;;  %v540_v8 = vld [vmem:[%s746_s1 + $0x18] sm:$0xff]  ;;  %v539_v10 = vld [vmem:[%s746_s1 + $0x10] sm:$0xff]  ;;  %s364_s15 = sshll.u32 %s600_s14, 4  ;;  %s365_s15 = int_to_ptr.vmem [resolvable:$true] %s364_s15 }
   0x9   :  { %v548_v9 = vld [vmem:[%s746_s1 + $0x58] sm:$0xff]  ;;  %v547_v11 = vld [vmem:[%s746_s1 + $0x50] sm:$0xff]  ;;  %v538_v12 = vld [vmem:[%s746_s1 + $0x8] sm:$0xff] }
   0xa   :  { %93 = vmatpush.bf16.msra.mxu0 %v542_v3  ;;  %v537_v13 = vld [vmem:[%s746_s1] sm:$0xff]  ;;  %v546_v16 = vld [vmem:[%s746_s1 + $0x48] sm:$0xff]  ;;  %v560_v18 = vld [vmem:[%s746_s1 + $0xb8] sm:$0xff] }
   0xb   :  { %178 = vmatpush.bf16.msra.mxu1 %v550_v5  ;;  %v21_v14 = vld [vmem:[%s745_s0] sm:$0xf]  ;;  %261 = vmatpush.bf16.msra.mxu2 %v560_v18  ;;  %v559_v19 = vld [vmem:[%s746_s1 + $0xb0] sm:$0xff]  ;;  %v558_v20 = vld [vmem:[%s746_s1 + $0xa8] sm:$0xff] }
   0xc   :  { %v22_v15 = vpack.c.bf16 %v21_v14, %v21_v14  ;;  %v545_v17 = vld [vmem:[%s746_s1 + $0x40] sm:$0xff]  ;;  %v556_v22 = vld [vmem:[%s746_s1 + $0x98] sm:$0xff]  ;;  %v555_v23 = vld [vmem:[%s746_s1 + $0x90] sm:$0xff] }
   0xd   :  { %v557_v21 = vld [vmem:[%s746_s1 + $0xa0] sm:$0xff]  ;;  %v554_v30 = vld [vmem:[%s746_s1 + $0x88] sm:$0xff]  ;;  %v568_v32 = vld [vmem:[%s748_s3 + $0x38] sm:$0xff] }
   0xe   :  { %94 = vmatpush.bf16.msra.mxu0 %v541_v6  ;;  %v570_v24 = vld [vmem:[%s747_s2] ss:$0 sm:$0xff]  ;;  %344 = vmatpush.bf16.msra.mxu3 %v568_v32  ;;  %v567_v33 = vld [vmem:[%s748_s3 + $0x30] sm:$0xff]  ;;  %v566_v34 = vld [vmem:[%s748_s3 + $0x28] sm:$0xff] }
   0xf   :  { %179 = vmatpush.bf16.msra.mxu1 %v549_v7  ;;  %262 = vmatpush.bf16.msra.mxu2 %v559_v19  ;;  %v553_v31 = vld [vmem:[%s746_s1 + $0x80] sm:$0xff]  ;;  %v564_v36 = vld [vmem:[%s748_s3 + $0x18] sm:$0xff]  ;;  %v563_v37 = vld [vmem:[%s748_s3 + $0x10] sm:$0xff] }
  0x10   :  { %v565_v35 = vld [vmem:[%s748_s3 + $0x20] sm:$0xff]  ;;  %v562_v44 = vld [vmem:[%s748_s3 + $0x8] sm:$0xff] }
  0x11   :  { %v571_v38 = vld [vmem:[%s747_s2 + $0x1] ss:$0 sm:$0xff]  ;;  %v572_v46 = vld [vmem:[%s747_s2 + $0x2] ss:$0 sm:$0xff]  ;;  %v573_v52 = vld [vmem:[%s749_s4] ss:$0 sm:$0xff] }
  0x12   :  { %95 = vmatpush.bf16.msra.mxu0 %v540_v8  ;;  %345 = vmatpush.bf16.msra.mxu3 %v567_v33  ;;  %v561_v45 = vld [vmem:[%s748_s3] sm:$0xff]  ;;  %s366_s3 = sshll.u32 %s750_s5, 4  ;;  %s367_s3 = int_to_ptr.hbm [resolvable:$true] %s366_s3 }
  0x13   :  { %180 = vmatpush.bf16.msra.mxu1 %v548_v9  ;;  %263 = vmatpush.bf16.msra.mxu2 %v558_v20 }
  0x16   :  { %96 = vmatpush.bf16.msra.mxu0 %v539_v10  ;;  %346 = vmatpush.bf16.msra.mxu3 %v566_v34 }
  0x17   :  { %181 = vmatpush.bf16.msra.mxu1 %v547_v11  ;;  %264 = vmatpush.bf16.msra.mxu2 %v557_v21 }
  0x1a   :  { %97 = vmatpush.bf16.msra.mxu0 %v538_v12  ;;  %347 = vmatpush.bf16.msra.mxu3 %v565_v35 }
  0x1b   :  { %182 = vmatpush.bf16.msra.mxu1 %v546_v16  ;;  %265 = vmatpush.bf16.msra.mxu2 %v556_v22 }
  0x1e   :  { %98 = vmatpush.bf16.msra.mxu0 %v537_v13  ;;  %348 = vmatpush.bf16.msra.mxu3 %v564_v36 }
  0x1f   :  { %183 = vmatpush.bf16.msra.mxu1 %v545_v17  ;;  %266 = vmatpush.bf16.msra.mxu2 %v555_v23 }
  0x21   :  { %99 = vmatmul.bf16.vlgmr.msra.gmra.mxu0 %v22_v15 }
  0x22   :  { %349 = vmatpush.bf16.msra.mxu3 %v563_v37 }
  0x23   :  { %267 = vmatpush.bf16.msra.mxu2 %v554_v30 }
  0x26   :  { %350 = vmatpush.bf16.msra.mxu3 %v562_v44 }
  0x27   :  { %268 = vmatpush.bf16.msra.mxu2 %v553_v31 }
  0x2a   :  { %351 = vmatpush.bf16.msra.mxu3 %v561_v45 }
  0x9e   :  { %v100_v25 = vpop.f32.mrf.mxu0 }
  0x9f   :  { %v101_v26 = vadd.f32 %v570_v24, %v100_v25 }
  0xa1   :  { %v104_v27 = vmax.f32 %v101_v26, 0.0 }
  0xa3   :  { %v105_v28 = vpack.c.bf16 %v104_v27, %v104_v27 }
  0xa5   :  { %184 = vmatmul.bf16.vlgmr.msra.gmra.mxu1 %v105_v28 }
  0xa6   :  { %v102_v29 = vpop.f32.mrf.mxu0 }
 0x122   :  { %v185_v39 = vpop.f32.mrf.mxu1 }
 0x123   :  { %v186_v40 = vadd.f32 %v571_v38, %v185_v39 }
 0x125   :  { %v189_v41 = vmax.f32 %v186_v40, 0.0 }
 0x127   :  { %v190_v42 = vpack.c.bf16 %v189_v41, %v189_v41 }
 0x129   :  { %269 = vmatmul.bf16.vlgmr.msra.gmra.mxu2 %v190_v42 }
 0x12a   :  { %v187_v43 = vpop.f32.mrf.mxu1 }
 0x1ac   :  { %v270_v47 = vpop.f32.mrf.mxu2 }
 0x1ad   :  { %v271_v48 = vadd.f32 %v572_v46, %v270_v47 }
 0x1af   :  { %v274_v49 = vmax.f32 %v271_v48, 0.0 }
 0x1b1   :  { %v275_v50 = vpack.c.bf16 %v274_v49, %v274_v49 }
 0x1b3   :  { %352 = vmatmul.bf16.vlgmr.msra.gmra.mxu3 %v275_v50 }
 0x1b4   :  { %v272_v51 = vpop.f32.mrf.mxu2 }
 0x236   :  { %v353_v53 = vpop.f32.mrf.mxu3 }
 0x237   :  { %v354_v54 = vadd.f32 %v573_v52, %v353_v53 }
 0x239   :  { %358 = vst.msk [vmem:[#allocation2] sm:$0xf] %vm357_vm0, %v354_v54 }
 0x23a   :  { %369 = dma.vmem_to_hbm [thread:$0]  %s365_s15, 64, %s367_s3, [#allocation3]  }
 0x23e   :  { %v355_v55 = vpop.f32.mrf.mxu3 }
 0x23f   :  { %598 = dma.done.wait [#allocation3], 64  }
 0x240   :  { %599 = vsyncadd [#allocation3], 4294967232 }
 0x241   :  { %374 = vsyncpa [#allocation3], 1 }

// kernel: rnn_nli_forward.2
= control target key start
LH: loop header
LB: loop body
LE: loop exit
PB: predicated region body
PF: predicated region fallthrough
CT: control target
= control target key end

     0   :  { %vm65_vm0 = vcmask 261120   ;;  %v1445_v20 = vmov 0   ;;  %s1446_s22 = smov 64   ;;  %s1864_s1 = inlined_call_operand.vmem [shape: bf16[32,32], index: 1, kind: input, shape index: {}]   ;;  %s1865_s0 = inlined_call_operand.vmem [shape: f32[64,32], index: 0, kind: input, shape index: {}]   ;;  %s1866_s2 = inlined_call_operand.vmem [shape: f32[1,32], index: 2, kind: input, shape index: {}]   ;;  %s1867_s5 = inlined_call_operand.vmem [shape: f32[1,128], index: 5, kind: input, shape index: {}]   ;;  %s1868_s4 = inlined_call_operand.vmem [shape: bf16[32,128], index: 4, kind: input, shape index: {}]   ;;  %s1869_s3 = inlined_call_operand.vmem [shape: bf16[32,128], index: 3, kind: input, shape index: {}]   ;;  %s1870_s6 = inlined_call_operand.vmem [shape: bf16[32,128], index: 6, kind: input, shape index: {}]   ;;  %s1871_s8 = inlined_call_operand.vmem [shape: f32[1,128], index: 8, kind: input, shape index: {}]   ;;  %s1872_s7 = inlined_call_operand.vmem [shape: bf16[32,128], index: 7, kind: input, shape index: {}]   ;;  %s1873_s9 = inlined_call_operand.vmem [shape: f32[4,128], index: 9, kind: output, shape index: {}]  }
   0x1   :  { %v1300_v0 = vld [vmem:[%s1864_s1 + $0x8] sm:$0xff]  ;;  %v1299_v1 = vld [vmem:[%s1864_s1] sm:$0xff]  ;;  %v35_v5 = vld [vmem:[%s1865_s0 + $0x10] sm:$0xff] }
   0x2   :  { %84 = vmatpush.bf16.msra.mxu0 %v1300_v0  ;;  %v33_v2 = vld [vmem:[%s1865_s0] sm:$0xff]  ;;  %v34_v3 = vld [vmem:[%s1865_s0 + $0x8] sm:$0xff]  ;;  %v36_v6 = vld [vmem:[%s1865_s0 + $0x18] sm:$0xff] }
   0x3   :  { %v41_v4 = vpack.c.bf16 %v34_v3, %v33_v2  ;;  %v42_v7 = vpack.c.bf16 %v36_v6, %v35_v5  ;;  %v37_v8 = vld [vmem:[%s1865_s0 + $0x20] sm:$0xff]  ;;  %v38_v9 = vld [vmem:[%s1865_s0 + $0x28] sm:$0xff]  ;;  %v39_v11 = vld [vmem:[%s1865_s0 + $0x30] sm:$0xff] }
   0x4   :  { %v43_v10 = vpack.c.bf16 %v38_v9, %v37_v8  ;;  %v40_v12 = vld [vmem:[%s1865_s0 + $0x38] sm:$0xff]  ;;  %v1536_v14 = vld [vmem:[%s1868_s4 + $0x8] sm:$0xff]  ;;  %v1549_v17 = vld [vmem:[%s1868_s4] sm:$0xff] }
   0x5   :  { %v44_v13 = vpack.c.bf16 %v40_v12, %v39_v11  ;;  %258 = vmatpush.bf16.msra.mxu3 %v1536_v14  ;;  %v1302_v15 = vld [vmem:[%s1869_s3 + $0x8] sm:$0xff]  ;;  %v1301_v18 = vld [vmem:[%s1869_s3] sm:$0xff] }
   0x6   :  { %85 = vmatpush.bf16.msra.mxu0 %v1299_v1  ;;  %v1304_v16 = vld [vmem:[%s1870_s6 + $0x8] sm:$0xff]  ;;  %157 = vmatpush.bf16.msra.mxu1 %v1302_v15  ;;  %v1303_v19 = vld [vmem:[%s1870_s6] sm:$0xff] }
   0x7   :  { %206 = vmatpush.bf16.msra.mxu2 %v1304_v16  ;;  %v1313_v22 = vld [vmem:[%s1866_s2] ss:$0 sm:$0xff]  ;;  %v1573_v32 = vld [vmem:[%s1872_s7 + $0x8] sm:$0xff] }
   0x8   :  { %v1580_v36 = vld [vmem:[%s1872_s7] sm:$0xff] }
   0x9   :  { %1225 = vmatmul.msk.bf16.vlgmr.msra.gmra.mxu0 %vm65_vm0, %v41_v4  ;;  %259 = vmatpush.bf16.msra.mxu3 %v1549_v17  ;;  %v1599_v54 = vld [vmem:[%s1867_s5] ss:$0 sm:$0xff] }
   0xa   :  { %499 = vmatpush.bf16.msrb.mxu0 %v1536_v14  ;;  %158 = vmatpush.bf16.msra.mxu1 %v1301_v18  ;;  %v1315_v58 = vld [vmem:[%s1871_s8] ss:$0 sm:$0xff]  ;;  %s1447_s8 = smov 32  }
   0xb   :  { %207 = vmatpush.bf16.msra.mxu2 %v1303_v19 }
   0xc   :  { %260 = vmatmul.bf16.vlgmr.msra.gmra.mxu3 %v1445_v20 }
   0xd   :  { %284 = vmatpush.bf16.msrb.mxu3 %v1573_v32 }
   0xe   :  { %500 = vmatpush.bf16.msrb.mxu0 %v1549_v17  ;;  %520 = vmatpush.bf16.msrb.mxu1 %v1573_v32 }
   0xf   :  { %617 = vmatpush.bf16.msrb.mxu2 %v1536_v14 }
  0x11   :  { %285 = vmatpush.bf16.msrb.mxu3 %v1580_v36 }
  0x12   :  { %735 = vmatpush.bf16.msra.mxu0 %v1536_v14  ;;  %521 = vmatpush.bf16.msrb.mxu1 %v1580_v36 }
  0x13   :  { %618 = vmatpush.bf16.msrb.mxu2 %v1549_v17 }
  0x15   :  { %381 = vmatpush.bf16.msra.mxu3 %v1536_v14 }
  0x16   :  { %736 = vmatpush.bf16.msra.mxu0 %v1549_v17 }
  0x19   :  { %1226 = vmatmul.msk.bf16.gmra.mxu0 %vm65_vm0, %v42_v7  ;;  %382 = vmatpush.bf16.msra.mxu3 %v1549_v17 }
  0x1c   :  { %286 = vmatmul.bf16.vlgmr.msrb.gmra.mxu3 %v1445_v20 }
  0x1d   :  { %402 = vmatpush.bf16.msrb.mxu3 %v1573_v32 }
  0x21   :  { %403 = vmatpush.bf16.msrb.mxu3 %v1580_v36 }
  0x29   :  { %1227 = vmatmul.msk.bf16.gmra.mxu0 %vm65_vm0, %v43_v10 }
  0x39   :  { %1228 = vmatmul.msk.bf16.gmra.mxu0 %vm65_vm0, %v44_v13 }
  0x86   :  { %v87_v21 = vpop.f32.mrf.mxu0 }
  0x87   :  { %v88_v23 = vadd.f32 %v1313_v22, %v87_v21 }
  0x89   :  { %v107_v26 = vmax.f32 %v88_v23, 0.0 }
  0x8e   :  { %v89_v24 = vpop.f32.mrf.mxu0 }
  0x8f   :  { %v90_v25 = vadd.f32 %v1313_v22, %v89_v24  ;;  %v261_v52 = vpop.f32.mrf.mxu3 }
  0x91   :  { %v108_v27 = vmax.f32 %v90_v25, 0.0 }
  0x93   :  { %v115_v28 = vpack.c.bf16 %v108_v27, %v107_v26 }
  0x95   :  { %1237 = vmatmul.msk.bf16.vlgmr.msra.gmra.mxu1 %vm65_vm0, %v115_v28  ;;  %1249 = vmatmul.msk.bf16.vlgmr.msra.gmra.mxu2 %vm65_vm0, %v115_v28 }
  0x96   :  { %v92_v29 = vpop.f32.mrf.mxu0  ;;  %853 = vmatpush.bf16.msra.mxu2 %v1536_v14  ;;  %756 = vmatpush.bf16.msra.mxu1 %v1573_v32 }
  0x97   :  { %v93_v30 = vadd.f32 %v1313_v22, %v92_v29  ;;  %v263_v53 = vpop.f32.mrf.mxu3 }
  0x99   :  { %v109_v34 = vmax.f32 %v93_v30, 0.0 }
  0x9a   :  { %854 = vmatpush.bf16.msra.mxu2 %v1549_v17  ;;  %757 = vmatpush.bf16.msra.mxu1 %v1580_v36 }
  0x9e   :  { %v94_v31 = vpop.f32.mrf.mxu0 }
  0x9f   :  { %v95_v33 = vadd.f32 %v1313_v22, %v94_v31  ;;  %v287_v5 = vpop.f32.mrf.mxu3 }
  0xa1   :  { %v110_v35 = vmax.f32 %v95_v33, 0.0 }
  0xa3   :  { %v116_v37 = vpack.c.bf16 %v110_v35, %v109_v34 }
  0xa5   :  { %1238 = vmatmul.msk.bf16.gmra.mxu1 %vm65_vm0, %v116_v37  ;;  %1250 = vmatmul.msk.bf16.gmra.mxu2 %vm65_vm0, %v116_v37 }
  0xa6   :  { %v97_v38 = vpop.f32.mrf.mxu0 }
  0xa7   :  { %v98_v39 = vadd.f32 %v1313_v22, %v97_v38  ;;  %v289_v10 = vpop.f32.mrf.mxu3 }
  0xa9   :  { %v111_v42 = vmax.f32 %v98_v39, 0.0 }
  0xae   :  { %v99_v40 = vpop.f32.mrf.mxu0 }
  0xaf   :  { %v100_v41 = vadd.f32 %v1313_v22, %v99_v40 }
  0xb1   :  { %v112_v43 = vmax.f32 %v100_v41, 0.0 }
  0xb3   :  { %v117_v44 = vpack.c.bf16 %v112_v43, %v111_v42 }
  0xb5   :  { %1239 = vmatmul.msk.bf16.gmra.mxu1 %vm65_vm0, %v117_v44  ;;  %1251 = vmatmul.msk.bf16.gmra.mxu2 %vm65_vm0, %v117_v44 }
  0xb6   :  { %v102_v45 = vpop.f32.mrf.mxu0 }
  0xb7   :  { %v103_v46 = vadd.f32 %v1313_v22, %v102_v45 }
  0xb9   :  { %v113_v49 = vmax.f32 %v103_v46, 0.0 }
  0xbe   :  { %v104_v47 = vpop.f32.mrf.mxu0 }
  0xbf   :  { %v105_v48 = vadd.f32 %v1313_v22, %v104_v47 }
  0xc1   :  { %v114_v50 = vmax.f32 %v105_v48, 0.0 }
  0xc3   :  { %v118_v51 = vpack.c.bf16 %v114_v50, %v113_v49 }
  0xc5   :  { %1240 = vmatmul.msk.bf16.gmra.mxu1 %vm65_vm0, %v118_v51  ;;  %1252 = vmatmul.msk.bf16.gmra.mxu2 %vm65_vm0, %v118_v51 }
 0x112   :  { %v160_v55 = vpop.f32.mrf.mxu1 }
 0x113   :  { %v161_v56 = vadd.f32 %v1599_v54, %v160_v55 }
 0x115   :  { %v265_v57 = vadd.f32 %v261_v52, %v161_v56 }
 0x117   :  { %1316 = vtanh.f32 %v265_v57  ;;  %v1269_v28 = vmul.f32 -1.442695, %v265_v57 }
 0x118   :  { %v209_v59 = vpop.f32.mrf.mxu2 }
 0x119   :  { %v1605_v60 = vadd.f32 %v1315_v58, %v209_v59 }
 0x11a   :  { %v1607_v61 = vpop.f32.mrf.mxu1 }
 0x11d   :  { %v1317_v62 = vpop.eup %1316 }
 0x11e   :  { %314 = vrot.lane.b32.xlu0 %v1317_v62, %s1446_s22 }
 0x120   :  { %v211_v63 = vpop.f32.mrf.mxu2 }
 0x121   :  { %v1610_v0 = vadd.f32 %v1315_v58, %v211_v63 }
 0x122   :  { %v1612_v1 = vpop.f32.mrf.mxu1 }
 0x128   :  { %v214_v2 = vpop.f32.mrf.mxu2 }
 0x129   :  { %v1614_v3 = vadd.f32 %v1315_v58, %v214_v2 }
 0x12a   :  { %v167_v4 = vpop.f32.mrf.mxu1 }
 0x12b   :  { %v1617_v6 = vadd.f32 %v1599_v54, %v167_v4 }
 0x130   :  { %v216_v7 = vpop.f32.mrf.mxu2 }
 0x131   :  { %v1619_v8 = vadd.f32 %v1315_v58, %v216_v7 }
 0x132   :  { %v170_v9 = vpop.f32.mrf.mxu1 }
 0x133   :  { %v1622_v11 = vadd.f32 %v1599_v54, %v170_v9 }
 0x138   :  { %v219_v12 = vpop.f32.mrf.mxu2 }
 0x139   :  { %v1624_v13 = vadd.f32 %v1315_v58, %v219_v12 }
 0x13a   :  { %v172_v15 = vpop.f32.mrf.mxu1 }
 0x13b   :  { %v1627_v16 = vadd.f32 %v1599_v54, %v172_v15 }
 0x140   :  { %v221_v18 = vpop.f32.mrf.mxu2 }
 0x141   :  { %v1629_v19 = vadd.f32 %v1315_v58, %v221_v18 }
 0x142   :  { %v175_v20 = vpop.f32.mrf.mxu1 }
 0x143   :  { %v1632_v21 = vadd.f32 %v1599_v54, %v175_v20 }
 0x148   :  { %v224_v22 = vpop.f32.mrf.mxu2 }
 0x149   :  { %v1634_v23 = vadd.f32 %v1315_v58, %v224_v22 }
 0x150   :  { %v226_v24 = vpop.f32.mrf.mxu2 }
 0x151   :  { %v227_v25 = vadd.f32 %v1315_v58, %v226_v24 }
 0x153   :  { %v291_v26 = vadd.f32 %v287_v5, %v227_v25 }
 0x155   :  { %1318 = vtanh.f32 %v291_v26  ;;  %v1270_v45 = vmul.f32 -1.442695, %v291_v26 }
 0x156   :  { %1320 = vpow2.f32 %v1269_v28  ;;  %v163_v28 = vadd.f32 %v1599_v54, %v1607_v61 }
 0x15b   :  { %v1319_v27 = vpop.eup %1318 }
 0x15c   :  { %351 = vrot.lane.b32.xlu0 %v1319_v27, %s1446_s22  ;;  %v1321_v29 = vpop.eup %1320 }
 0x15d   :  { %v295_v30 = vadd.f32 1.0, %v1321_v29 }
 0x15f   :  { %1322 = vrcp.f32 %v295_v30  ;;  %v307_v38 = vand.u32 2147483648, %v295_v30  ;;  %vm301_vm2 = vweird.f32 %v295_v30  ;;  %v305_v39 = vand.u32 2147483647, %v295_v30 }
 0x160   :  { %1324 = vpow2.f32 %v1270_v45 }
 0x161   :  { %v308_v41 = vor.u32 1.1754944e-38, %v307_v38  ;;  %vm306_vm4 = vcmp.eq.f32.partialorder %v305_v39, 8.507059e+37 }
 0x165   :  { %v1323_v31 = vpop.eup %1322 }
 0x166   :  { %v297_v33 = vmul.f32 %v1323_v31, %v295_v30  ;;  %vm302_vm1 = vweird.f32 %v1323_v31  ;;  %v1325_v46 = vpop.eup %1324 }
 0x167   :  { %vm303_vm3 = vmor %vm301_vm2, %vm302_vm1  ;;  %v332_v47 = vadd.f32 1.0, %v1325_v46 }
 0x168   :  { %v298_v34 = vsub.f32 1.0, %v297_v33 }
 0x169   :  { %1326 = vrcp.f32 %v332_v47  ;;  %v344_v53 = vand.u32 2147483648, %v332_v47  ;;  %vm338_vm6 = vweird.f32 %v332_v47  ;;  %v342_v55 = vand.u32 2147483647, %v332_v47 }
 0x16a   :  { %v299_v35 = vmul.f32 %v1323_v31, %v298_v34 }
 0x16b   :  { %v345_v57 = vor.u32 1.1754944e-38, %v344_v53  ;;  %vm343_vm8 = vcmp.eq.f32.partialorder %v342_v55, 8.507059e+37 }
 0x16c   :  { %v300_v37 = vadd.f32 %v1323_v31, %v299_v35 }
 0x16e   :  { %v304_v40 = vsel %vm303_vm3, %v1323_v31, %v300_v37 }
 0x16f   :  { %v309_v43 = vsel %vm306_vm4, %v308_v41, %v304_v40  ;;  %v1327_v48 = vpop.eup %1326 }
 0x170   :  { %v334_v49 = vmul.f32 %v1327_v48, %v332_v47  ;;  %vm339_vm5 = vweird.f32 %v1327_v48  ;;  %v312_v63 = vmul.f32 0.0, %v309_v43 }
 0x171   :  { %vm340_vm7 = vmor %vm338_vm6, %vm339_vm5 }
 0x172   :  { %v335_v50 = vsub.f32 1.0, %v334_v49 }
 0x174   :  { %v336_v51 = vmul.f32 %v1327_v48, %v335_v50 }
 0x176   :  { %v337_v52 = vadd.f32 %v1327_v48, %v336_v51 }
 0x178   :  { %v341_v56 = vsel %vm340_vm7, %v1327_v48, %v337_v52 }
 0x179   :  { %v346_v58 = vsel %vm343_vm8, %v345_v57, %v341_v56 }
 0x17a   :  { %v349_v7 = vmul.f32 0.0, %v346_v58 }
 0x190   :  { %v315_v42 = vpop.permute.xlu0 %314 }
 0x191   :  { %v317_v44 = vmul.f32 %v315_v42, %v309_v43 }
 0x193   :  { %319 = vrot.lane.b32.xlu1 %v317_v44, %s1447_s8 }
 0x1ce   :  { %v352_v59 = vpop.permute.xlu0 %351 }
 0x1cf   :  { %v354_v62 = vmul.f32 %v352_v59, %v346_v58 }
 0x1d1   :  { %356 = vrot.lane.b32.xlu1 %v354_v62, %s1447_s8 }
 0x205   :  { %v320_v2 = vpop.permute.xlu1 %319 }
 0x206   :  { %v1639_v4 = vadd.f32 %v320_v2, %v312_v63 }
 0x208   :  { %1328 = vtanh.f32 %v1639_v4 }
 0x20e   :  { %v1329_v5 = vpop.eup %1328 }
 0x20f   :  { %325 = vrot.lane.b32.xlu2 %v1329_v5, %s1446_s22 }
 0x243   :  { %v357_v9 = vpop.permute.xlu1 %356 }
 0x244   :  { %v1643_v10 = vadd.f32 %v357_v9, %v349_v7 }
 0x246   :  { %1330 = vtanh.f32 %v1643_v10 }
 0x24c   :  { %v1331_v12 = vpop.eup %1330 }
 0x24d   :  { %362 = vrot.lane.b32.xlu2 %v1331_v12, %s1446_s22 }
 0x269   :  { %v326_v15 = vpop.permute.xlu2 %325 }
 0x26a   :  { %v1647_v18 = vmul.f32 %v326_v15, %v309_v43 }
 0x26c   :  { %v368_v20 = vpack.c.bf16 %v1647_v18, %v1647_v18 }
 0x26e   :  { %370 = vrot.lane.b32.xlu0 %v368_v20, %s1447_s8 }
 0x2a7   :  { %v363_v22 = vpop.permute.xlu2 %362 }
 0x2a8   :  { %v1652_v24 = vmul.f32 %v363_v22, %v346_v58 }
 0x2aa   :  { %v389_v25 = vpack.c.bf16 %v1652_v24, %v1652_v24 }
 0x2ac   :  { %391 = vrot.lane.b32.xlu1 %v389_v25, %s1447_s8 }
 0x2e0   :  { %v371_v26 = vpop.permute.xlu0 %370 }
 0x2e1   :  { %1271 = vmatmul.msk.bf16.vlgmr.msra.gmra.mxu3 %vm65_vm0, %v371_v26 }
 0x2e2   :  { %638 = vmatpush.bf16.msra.mxu3 %v1573_v32 }
 0x2e6   :  { %639 = vmatpush.bf16.msra.mxu3 %v1580_v36 }
 0x31e   :  { %v392_v27 = vpop.permute.xlu1 %391 }
 0x31f   :  { %1272 = vmatmul.msk.bf16.vlgmr.msrb.gmra.mxu3 %vm65_vm0, %v392_v27 }
 0x320   :  { %874 = vmatpush.bf16.msrb.mxu3 %v1573_v32 }
 0x324   :  { %875 = vmatpush.bf16.msrb.mxu3 %v1580_v36 }
 0x364   :  { %v384_v29 = vpop.f32.mrf.mxu3 }
 0x365   :  { %v388_v30 = vadd.f32 %v384_v29, %v163_v28 }
 0x367   :  { %1332 = vtanh.f32 %v388_v30  ;;  %v1273_v34 = vmul.f32 -1.442695, %v388_v30 }
 0x369   :  { %1334 = vpow2.f32 %v1273_v34 }
 0x36c   :  { %v386_v31 = vpop.f32.mrf.mxu3 }
 0x36d   :  { %v1333_v33 = vpop.eup %1332 }
 0x36e   :  { %432 = vrot.lane.b32.xlu2 %v1333_v33, %s1446_s22 }
 0x36f   :  { %v1335_v38 = vpop.eup %1334 }
 0x370   :  { %v413_v39 = vadd.f32 1.0, %v1335_v38 }
 0x372   :  { %v425_v46 = vand.u32 2147483648, %v413_v39  ;;  %vm419_vm10 = vweird.f32 %v413_v39  ;;  %v423_v47 = vand.u32 2147483647, %v413_v39 }
 0x374   :  { %vm424_vm12 = vcmp.eq.f32.partialorder %v423_v47, 8.507059e+37 }
 0x3a2   :  { %v405_v35 = vpop.f32.mrf.mxu3 }
 0x3a3   :  { %v409_v37 = vadd.f32 %v405_v35, %v1634_v23  ;;  %v426_v23 = vor.u32 1.1754944e-38, %v425_v46 }
 0x3a5   :  { %1336 = vtanh.f32 %v409_v37  ;;  %v1274_v52 = vmul.f32 -1.442695, %v409_v37 }
 0x3a6   :  { %1338 = vrcp.f32 %v413_v39 }
 0x3a7   :  { %1340 = vpow2.f32 %v1274_v52 }
 0x3aa   :  { %v407_v40 = vpop.f32.mrf.mxu3 }
 0x3ab   :  { %v1337_v41 = vpop.eup %1336 }
 0x3ac   :  { %469 = vrot.lane.b32.xlu0 %v1337_v41, %s1446_s22  ;;  %v1339_v61 = vpop.eup %1338 }
 0x3ad   :  { %v415_v42 = vmul.f32 %v1339_v61, %v413_v39  ;;  %vm420_vm9 = vweird.f32 %v1339_v61  ;;  %v1341_v53 = vpop.eup %1340  ;;  %v166_v39 = vadd.f32 %v1599_v54, %v1612_v1 }
 0x3ae   :  { %vm421_vm11 = vmor %vm419_vm10, %vm420_vm9  ;;  %v450_v55 = vadd.f32 1.0, %v1341_v53 }
 0x3af   :  { %v416_v43 = vsub.f32 1.0, %v415_v42 }
 0x3b0   :  { %1342 = vrcp.f32 %v450_v55  ;;  %v462_v63 = vand.u32 2147483648, %v450_v55  ;;  %vm456_vm14 = vweird.f32 %v450_v55  ;;  %v460_v2 = vand.u32 2147483647, %v450_v55 }
 0x3b1   :  { %v417_v44 = vmul.f32 %v1339_v61, %v416_v43  ;;  %v1699_v43 = vpop.f32.mrf.mxu1 }
 0x3b2   :  { %v463_v7 = vor.u32 1.1754944e-38, %v462_v63  ;;  %vm461_vm1 = vcmp.eq.f32.partialorder %v460_v2, 8.507059e+37 }
 0x3b3   :  { %v418_v45 = vadd.f32 %v1339_v61, %v417_v44 }
 0x3b5   :  { %v422_v48 = vsel %vm421_vm11, %v1339_v61, %v418_v45 }
 0x3b6   :  { %v427_v49 = vsel %vm424_vm12, %v426_v23, %v422_v48  ;;  %v1343_v56 = vpop.eup %1342 }
 0x3b7   :  { %v452_v57 = vmul.f32 %v1343_v56, %v450_v55  ;;  %vm457_vm13 = vweird.f32 %v1343_v56  ;;  %v430_v20 = vmul.f32 %v427_v49, %v1639_v4 }
 0x3b8   :  { %vm458_vm15 = vmor %vm456_vm14, %vm457_vm13 }
 0x3b9   :  { %v453_v58 = vsub.f32 1.0, %v452_v57 }
 0x3bb   :  { %v454_v59 = vmul.f32 %v1343_v56, %v453_v58 }
 0x3bd   :  { %v455_v62 = vadd.f32 %v1343_v56, %v454_v59 }
 0x3bf   :  { %v459_v5 = vsel %vm458_vm15, %v1343_v56, %v455_v62 }
 0x3c0   :  { %v464_v12 = vsel %vm461_vm1, %v463_v7, %v459_v5 }
 0x3c1   :  { %v467_v27 = vmul.f32 %v464_v12, %v1643_v10 }
 0x3c8   :  { %v433_v50 = vpop.permute.xlu2 %432 }
 0x3c9   :  { %v435_v51 = vmul.f32 %v433_v50, %v427_v49 }
 0x3cb   :  { %437 = vrot.lane.b32.xlu1 %v435_v51, %s1447_s8 }
 0x41e   :  { %v470_v9 = vpop.permute.xlu0 %469 }
 0x41f   :  { %v472_v15 = vmul.f32 %v470_v9, %v464_v12 }
 0x421   :  { %474 = vrot.lane.b32.xlu2 %v472_v15, %s1447_s8 }
 0x43d   :  { %v438_v22 = vpop.permute.xlu1 %437 }
 0x43e   :  { %v1671_v25 = vadd.f32 %v438_v22, %v430_v20 }
 0x440   :  { %1344 = vtanh.f32 %v1671_v25 }
 0x446   :  { %v1345_v26 = vpop.eup %1344 }
 0x447   :  { %443 = vrot.lane.b32.xlu0 %v1345_v26, %s1446_s22 }
 0x47b   :  { %v475_v28 = vpop.permute.xlu2 %474 }
 0x47c   :  { %v1676_v29 = vadd.f32 %v475_v28, %v467_v27 }
 0x47e   :  { %1346 = vtanh.f32 %v1676_v29 }
 0x484   :  { %v1347_v30 = vpop.eup %1346 }
 0x485   :  { %480 = vrot.lane.b32.xlu1 %v1347_v30, %s1446_s22 }
 0x4b9   :  { %v444_v31 = vpop.permute.xlu0 %443 }
 0x4ba   :  { %v1680_v4 = vmul.f32 %v444_v31, %v427_v49 }
 0x4bc   :  { %v486_v33 = vpack.c.bf16 %v1680_v4, %v1680_v4 }
 0x4be   :  { %488 = vrot.lane.b32.xlu2 %v486_v33, %s1447_s8 }
 0x4f7   :  { %v481_v34 = vpop.permute.xlu1 %480 }
 0x4f8   :  { %v1685_v35 = vmul.f32 %v481_v34, %v464_v12 }
 0x4fa   :  { %v507_v10 = vpack.c.bf16 %v1685_v35, %v1685_v35 }
 0x4fc   :  { %509 = vrot.lane.b32.xlu0 %v507_v10, %s1447_s8 }
 0x518   :  { %v489_v37 = vpop.permute.xlu2 %488 }
 0x519   :  { %1275 = vmatmul.msk.bf16.vlgmr.msrb.gmra.mxu0 %vm65_vm0, %v489_v37 }
 0x51a   :  { %971 = vmatpush.bf16.msrb.mxu0 %v1536_v14 }
 0x51e   :  { %972 = vmatpush.bf16.msrb.mxu0 %v1549_v17 }
 0x56e   :  { %v510_v38 = vpop.permute.xlu0 %509 }
 0x56f   :  { %1276 = vmatmul.msk.bf16.vlgmr.msrb.gmra.mxu1 %vm65_vm0, %v510_v38 }
 0x570   :  { %992 = vmatpush.bf16.msrb.mxu1 %v1573_v32 }
 0x574   :  { %993 = vmatpush.bf16.msrb.mxu1 %v1580_v36 }
 0x596   :  { %v502_v40 = vpop.f32.mrf.mxu0 }
 0x597   :  { %v506_v41 = vadd.f32 %v502_v40, %v166_v39 }
 0x599   :  { %1348 = vtanh.f32 %v506_v41  ;;  %v1277_v44 = vmul.f32 -1.442695, %v506_v41 }
 0x59b   :  { %1350 = vpow2.f32 %v1277_v44 }
 0x59e   :  { %v504_v61 = vpop.f32.mrf.mxu0 }
 0x59f   :  { %v1349_v42 = vpop.eup %1348 }
 0x5a0   :  { %550 = vrot.lane.b32.xlu1 %v1349_v42, %s1446_s22 }
 0x5a1   :  { %v1351_v47 = vpop.eup %1350 }
 0x5a2   :  { %v531_v48 = vadd.f32 1.0, %v1351_v47 }
 0x5a4   :  { %v543_v53 = vand.u32 2147483648, %v531_v48  ;;  %vm537_vm3 = vweird.f32 %v531_v48  ;;  %v541_v55 = vand.u32 2147483647, %v531_v48 }
 0x5a6   :  { %vm542_vm5 = vcmp.eq.f32.partialorder %v541_v55, 8.507059e+37 }
 0x5ec   :  { %v523_v45 = vpop.f32.mrf.mxu1 }
 0x5ed   :  { %v527_v46 = vadd.f32 %v523_v45, %v1629_v19  ;;  %v544_v19 = vor.u32 1.1754944e-38, %v543_v53 }
 0x5ef   :  { %1352 = vtanh.f32 %v527_v46  ;;  %v1278_v62 = vmul.f32 -1.442695, %v527_v46 }
 0x5f0   :  { %1354 = vrcp.f32 %v531_v48 }
 0x5f1   :  { %1356 = vpow2.f32 %v1278_v62 }
 0x5f4   :  { %v525_v23 = vpop.f32.mrf.mxu1 }
 0x5f5   :  { %v1353_v49 = vpop.eup %1352 }
 0x5f6   :  { %587 = vrot.lane.b32.xlu2 %v1353_v49, %s1446_s22  ;;  %v1355_v54 = vpop.eup %1354 }
 0x5f7   :  { %v533_v1 = vmul.f32 %v1355_v54, %v531_v48  ;;  %vm538_vm2 = vweird.f32 %v1355_v54  ;;  %v1357_v63 = vpop.eup %1356 }
 0x5f8   :  { %vm539_vm4 = vmor %vm537_vm3, %vm538_vm2  ;;  %v568_v2 = vadd.f32 1.0, %v1357_v63 }
 0x5f9   :  { %v534_v50 = vsub.f32 1.0, %v533_v1 }
 0x5fa   :  { %1358 = vrcp.f32 %v568_v2  ;;  %v580_v20 = vand.u32 2147483648, %v568_v2  ;;  %vm574_vm7 = vweird.f32 %v568_v2  ;;  %v578_v22 = vand.u32 2147483647, %v568_v2 }
 0x5fb   :  { %v535_v51 = vmul.f32 %v1355_v54, %v534_v50 }
 0x5fc   :  { %v581_v27 = vor.u32 1.1754944e-38, %v580_v20  ;;  %vm579_vm9 = vcmp.eq.f32.partialorder %v578_v22, 8.507059e+37 }
 0x5fd   :  { %v536_v52 = vadd.f32 %v1355_v54, %v535_v51 }
 0x5ff   :  { %v540_v56 = vsel %vm539_vm4, %v1355_v54, %v536_v52 }
 0x600   :  { %v545_v58 = vsel %vm542_vm5, %v544_v19, %v540_v56  ;;  %v1359_v5 = vpop.eup %1358 }
 0x601   :  { %v570_v7 = vmul.f32 %v1359_v5, %v568_v2  ;;  %vm575_vm6 = vweird.f32 %v1359_v5  ;;  %v548_v33 = vmul.f32 %v545_v58, %v1671_v25  ;;  %v484_v25 = vadd.f32 %v1680_v4, %v1647_v18 }
 0x602   :  { %vm576_vm8 = vmor %vm574_vm7, %vm575_vm6 }
 0x603   :  { %v571_v9 = vsub.f32 1.0, %v570_v7 }
 0x605   :  { %v572_v12 = vmul.f32 %v1359_v5, %v571_v9 }
 0x607   :  { %v573_v15 = vadd.f32 %v1359_v5, %v572_v12 }
 0x609   :  { %v577_v26 = vsel %vm576_vm8, %v1359_v5, %v573_v15 }
 0x60a   :  { %v582_v28 = vsel %vm579_vm9, %v581_v27, %v577_v26 }
 0x60b   :  { %v585_v38 = vmul.f32 %v582_v28, %v1676_v29  ;;  %v485_v29 = vadd.f32 %v1685_v35, %v1652_v24 }
 0x612   :  { %v551_v57 = vpop.permute.xlu1 %550 }
 0x613   :  { %v553_v59 = vmul.f32 %v551_v57, %v545_v58 }
 0x615   :  { %555 = vrot.lane.b32.xlu0 %v553_v59, %s1447_s8 }
 0x650   :  { %v588_v30 = vpop.permute.xlu2 %587 }
 0x651   :  { %v590_v31 = vmul.f32 %v588_v30, %v582_v28 }
 0x653   :  { %592 = vrot.lane.b32.xlu1 %v590_v31, %s1447_s8 }
 0x687   :  { %v556_v34 = vpop.permute.xlu0 %555 }
 0x688   :  { %v1706_v10 = vadd.f32 %v556_v34, %v548_v33 }
 0x68a   :  { %1360 = vtanh.f32 %v1706_v10 }
 0x690   :  { %v1361_v37 = vpop.eup %1360 }
 0x691   :  { %561 = vrot.lane.b32.xlu2 %v1361_v37, %s1446_s22 }
 0x6c5   :  { %v593_v39 = vpop.permute.xlu1 %592 }
 0x6c6   :  { %v1711_v40 = vadd.f32 %v593_v39, %v585_v38 }
 0x6c8   :  { %1362 = vtanh.f32 %v1711_v40 }
 0x6ce   :  { %v1363_v41 = vpop.eup %1362 }
 0x6cf   :  { %598 = vrot.lane.b32.xlu0 %v1363_v41, %s1446_s22 }
 0x6eb   :  { %v562_v61 = vpop.permute.xlu2 %561 }
 0x6ec   :  { %v564_v42 = vmul.f32 %v562_v61, %v545_v58 }
 0x6ee   :  { %v1717_v44 = vadd.f32 %v564_v42, %v484_v25  ;;  %v604_v45 = vpack.c.bf16 %v564_v42, %v564_v42 }
 0x6f0   :  { %606 = vrot.lane.b32.xlu1 %v604_v45, %s1447_s8 }
 0x741   :  { %v599_v46 = vpop.permute.xlu0 %598 }
 0x742   :  { %v601_v47 = vmul.f32 %v599_v46, %v582_v28 }
 0x744   :  { %v1722_v48 = vadd.f32 %v601_v47, %v485_v29  ;;  %v625_v23 = vpack.c.bf16 %v601_v47, %v601_v47 }
 0x746   :  { %627 = vrot.lane.b32.xlu2 %v625_v23, %s1447_s8 }
 0x762   :  { %v607_v49 = vpop.permute.xlu1 %606 }
 0x763   :  { %1279 = vmatmul.msk.bf16.vlgmr.msrb.gmra.mxu2 %vm65_vm0, %v607_v49 }
 0x764   :  { %1089 = vmatpush.bf16.msrb.mxu2 %v1536_v14 }
 0x768   :  { %1090 = vmatpush.bf16.msrb.mxu2 %v1549_v17 }
 0x7a0   :  { %v628_v18 = vpop.permute.xlu2 %627 }
 0x7a1   :  { %1280 = vmatmul.msk.bf16.vlgmr.msra.gmra.mxu3 %vm65_vm0, %v628_v18 }
 0x7a2   :  { %1110 = vmatpush.bf16.msra.mxu3 %v1573_v32 }
 0x7a6   :  { %1111 = vmatpush.bf16.msra.mxu3 %v1580_v36 }
 0x7e6   :  { %v620_v24 = vpop.f32.mrf.mxu2 }
 0x7e7   :  { %v624_v4 = vadd.f32 %v620_v24, %v1617_v6 }
 0x7e9   :  { %1364 = vtanh.f32 %v624_v4  ;;  %v1281_v51 = vmul.f32 -1.442695, %v624_v4 }
 0x7ee   :  { %v622_v35 = vpop.f32.mrf.mxu2 }
 0x7ef   :  { %v1365_v54 = vpop.eup %1364 }
 0x7f0   :  { %668 = vrot.lane.b32.xlu0 %v1365_v54, %s1446_s22 }
 0x824   :  { %v641_v1 = vpop.f32.mrf.mxu3 }
 0x825   :  { %v645_v14 = vadd.f32 %v641_v1, %v1624_v13 }
 0x827   :  { %1366 = vtanh.f32 %v645_v14  ;;  %v1282_v2 = vmul.f32 -1.442695, %v645_v14 }
 0x828   :  { %1368 = vpow2.f32 %v1281_v51 }
 0x82c   :  { %v643_v17 = vpop.f32.mrf.mxu3 }
 0x82d   :  { %v1367_v50 = vpop.eup %1366 }
 0x82e   :  { %705 = vrot.lane.b32.xlu1 %v1367_v50, %s1446_s22  ;;  %v1369_v32 = vpop.eup %1368 }
 0x82f   :  { %v649_v36 = vadd.f32 1.0, %v1369_v32 }
 0x831   :  { %1370 = vrcp.f32 %v649_v36  ;;  %v661_v19 = vand.u32 2147483648, %v649_v36  ;;  %vm655_vm11 = vweird.f32 %v649_v36  ;;  %v659_v57 = vand.u32 2147483647, %v649_v36 }
 0x832   :  { %1372 = vpow2.f32 %v1282_v2 }
 0x833   :  { %v662_v58 = vor.u32 1.1754944e-38, %v661_v19  ;;  %vm660_vm13 = vcmp.eq.f32.partialorder %v659_v57, 8.507059e+37 }
 0x837   :  { %v1371_v52 = vpop.eup %1370 }
 0x838   :  { %v651_v6 = vmul.f32 %v1371_v52, %v649_v36  ;;  %vm656_vm10 = vweird.f32 %v1371_v52  ;;  %v1373_v5 = vpop.eup %1372 }
 0x839   :  { %vm657_vm12 = vmor %vm655_vm11, %vm656_vm10  ;;  %v686_v7 = vadd.f32 1.0, %v1373_v5 }
 0x83a   :  { %v652_v53 = vsub.f32 1.0, %v651_v6 }
 0x83b   :  { %1374 = vrcp.f32 %v686_v7  ;;  %v698_v26 = vand.u32 2147483648, %v686_v7  ;;  %vm692_vm15 = vweird.f32 %v686_v7  ;;  %v696_v27 = vand.u32 2147483647, %v686_v7 }
 0x83c   :  { %v653_v55 = vmul.f32 %v1371_v52, %v652_v53 }
 0x83d   :  { %v699_v30 = vor.u32 1.1754944e-38, %v698_v26  ;;  %vm697_vm2 = vcmp.eq.f32.partialorder %v696_v27, 8.507059e+37 }
 0x83e   :  { %v654_v56 = vadd.f32 %v1371_v52, %v653_v55 }
 0x840   :  { %v658_v13 = vsel %vm657_vm12, %v1371_v52, %v654_v56 }
 0x841   :  { %v663_v62 = vsel %vm660_vm13, %v662_v58, %v658_v13  ;;  %v1375_v9 = vpop.eup %1374 }
 0x842   :  { %v688_v12 = vmul.f32 %v1375_v9, %v686_v7  ;;  %vm693_vm14 = vweird.f32 %v1375_v9  ;;  %v666_v37 = vmul.f32 %v663_v62, %v1706_v10 }
 0x843   :  { %vm694_vm1 = vmor %vm692_vm15, %vm693_vm14 }
 0x844   :  { %v689_v15 = vsub.f32 1.0, %v688_v12 }
 0x846   :  { %v690_v20 = vmul.f32 %v1375_v9, %v689_v15 }
 0x848   :  { %v691_v22 = vadd.f32 %v1375_v9, %v690_v20 }
 0x84a   :  { %v695_v28 = vsel %vm694_vm1, %v1375_v9, %v691_v22 }
 0x84b   :  { %v700_v33 = vsel %vm697_vm2, %v699_v30, %v695_v28 }
 0x84c   :  { %v703_v61 = vmul.f32 %v700_v33, %v1711_v40 }
 0x862   :  { %v669_v59 = vpop.permute.xlu0 %668 }
 0x863   :  { %v671_v63 = vmul.f32 %v669_v59, %v663_v62 }
 0x865   :  { %673 = vrot.lane.b32.xlu2 %v671_v63, %s1447_s8 }
 0x8a0   :  { %v706_v31 = vpop.permute.xlu1 %705 }
 0x8a1   :  { %v708_v34 = vmul.f32 %v706_v31, %v700_v33 }
 0x8a3   :  { %710 = vrot.lane.b32.xlu0 %v708_v34, %s1447_s8 }
 0x8bf   :  { %v674_v38 = vpop.permute.xlu2 %673 }
 0x8c0   :  { %v1738_v39 = vadd.f32 %v674_v38, %v666_v37 }
 0x8c2   :  { %1376 = vtanh.f32 %v1738_v39 }
 0x8c8   :  { %v1377_v41 = vpop.eup %1376 }
 0x8c9   :  { %679 = vrot.lane.b32.xlu1 %v1377_v41, %s1446_s22 }
 0x915   :  { %v711_v25 = vpop.permute.xlu0 %710 }
 0x916   :  { %v1743_v42 = vadd.f32 %v711_v25, %v703_v61 }
 0x918   :  { %1378 = vtanh.f32 %v1743_v42 }
 0x91e   :  { %v1379_v45 = vpop.eup %1378 }
 0x91f   :  { %716 = vrot.lane.b32.xlu2 %v1379_v45, %s1446_s22 }
 0x93b   :  { %v680_v46 = vpop.permute.xlu1 %679 }
 0x93c   :  { %v682_v10 = vmul.f32 %v680_v46, %v663_v62 }
 0x93e   :  { %v1748_v29 = vadd.f32 %v682_v10, %v1717_v44  ;;  %v722_v47 = vpack.c.bf16 %v682_v10, %v682_v10 }
 0x940   :  { %724 = vrot.lane.b32.xlu0 %v722_v47, %s1447_s8 }
 0x979   :  { %v717_v23 = vpop.permute.xlu2 %716 }
 0x97a   :  { %v719_v49 = vmul.f32 %v717_v23, %v700_v33 }
 0x97c   :  { %v1752_v40 = vadd.f32 %v719_v49, %v1722_v48  ;;  %v743_v18 = vpack.c.bf16 %v719_v49, %v719_v49 }
 0x97e   :  { %745 = vrot.lane.b32.xlu1 %v743_v18, %s1447_s8 }
 0x9b2   :  { %v725_v24 = vpop.permute.xlu0 %724 }
 0x9b3   :  { %1283 = vmatmul.msk.bf16.vlgmr.msra.gmra.mxu0 %vm65_vm0, %v725_v24 }
 0x9f0   :  { %v746_v4 = vpop.permute.xlu1 %745 }
 0x9f1   :  { %1284 = vmatmul.msk.bf16.vlgmr.msra.gmra.mxu1 %vm65_vm0, %v746_v4 }
 0xa30   :  { %v738_v35 = vpop.f32.mrf.mxu0 }
 0xa31   :  { %v742_v44 = vadd.f32 %v738_v35, %v1622_v11 }
 0xa33   :  { %1380 = vtanh.f32 %v742_v44  ;;  %v1285_v14 = vmul.f32 -1.442695, %v742_v44 }
 0xa35   :  { %1382 = vpow2.f32 %v1285_v14 }
 0xa38   :  { %v740_v54 = vpop.f32.mrf.mxu0 }
 0xa39   :  { %v1381_v1 = vpop.eup %1380 }
 0xa3a   :  { %786 = vrot.lane.b32.xlu2 %v1381_v1, %s1446_s22 }
 0xa3b   :  { %v1383_v50 = vpop.eup %1382 }
 0xa3c   :  { %v767_v51 = vadd.f32 1.0, %v1383_v50 }
 0xa3e   :  { %v779_v56 = vand.u32 2147483648, %v767_v51  ;;  %vm773_vm4 = vweird.f32 %v767_v51  ;;  %v777_v19 = vand.u32 2147483647, %v767_v51 }
 0xa40   :  { %vm778_vm6 = vcmp.eq.f32.partialorder %v777_v19, 8.507059e+37 }
 0xa6e   :  { %v759_v48 = vpop.f32.mrf.mxu1 }
 0xa6f   :  { %v763_v17 = vadd.f32 %v759_v48, %v1619_v8  ;;  %v780_v8 = vor.u32 1.1754944e-38, %v779_v56 }
 0xa71   :  { %1384 = vtanh.f32 %v763_v17  ;;  %v1286_v62 = vmul.f32 -1.442695, %v763_v17 }
 0xa72   :  { %1386 = vrcp.f32 %v767_v51 }
 0xa73   :  { %1388 = vpow2.f32 %v1286_v62 }
 0xa76   :  { %v761_v32 = vpop.f32.mrf.mxu1 }
 0xa77   :  { %v1385_v36 = vpop.eup %1384 }
 0xa78   :  { %823 = vrot.lane.b32.xlu0 %v1385_v36, %s1446_s22  ;;  %v1387_v52 = vpop.eup %1386 }
 0xa79   :  { %v769_v11 = vmul.f32 %v1387_v52, %v767_v51  ;;  %vm774_vm3 = vweird.f32 %v1387_v52  ;;  %v1389_v63 = vpop.eup %1388 }
 0xa7a   :  { %vm775_vm5 = vmor %vm773_vm4, %vm774_vm3  ;;  %v804_v2 = vadd.f32 1.0, %v1389_v63 }
 0xa7b   :  { %v770_v6 = vsub.f32 1.0, %v769_v11 }
 0xa7c   :  { %1390 = vrcp.f32 %v804_v2  ;;  %v816_v20 = vand.u32 2147483648, %v804_v2  ;;  %vm810_vm8 = vweird.f32 %v804_v2  ;;  %v814_v22 = vand.u32 2147483647, %v804_v2 }
 0xa7d   :  { %v771_v53 = vmul.f32 %v1387_v52, %v770_v6 }
 0xa7e   :  { %v817_v27 = vor.u32 1.1754944e-38, %v816_v20  ;;  %vm815_vm10 = vcmp.eq.f32.partialorder %v814_v22, 8.507059e+37 }
 0xa7f   :  { %v772_v55 = vadd.f32 %v1387_v52, %v771_v53 }
 0xa81   :  { %v776_v57 = vsel %vm775_vm5, %v1387_v52, %v772_v55 }
 0xa82   :  { %v781_v13 = vsel %vm778_vm6, %v780_v8, %v776_v57  ;;  %v1391_v5 = vpop.eup %1390 }
 0xa83   :  { %v806_v7 = vmul.f32 %v1391_v5, %v804_v2  ;;  %vm811_vm7 = vweird.f32 %v1391_v5  ;;  %v784_v33 = vmul.f32 %v781_v13, %v1738_v39 }
 0xa84   :  { %vm812_vm9 = vmor %vm810_vm8, %vm811_vm7 }
 0xa85   :  { %v807_v9 = vsub.f32 1.0, %v806_v7 }
 0xa87   :  { %v808_v12 = vmul.f32 %v1391_v5, %v807_v9 }
 0xa89   :  { %v809_v15 = vadd.f32 %v1391_v5, %v808_v12 }
 0xa8b   :  { %v813_v26 = vsel %vm812_vm9, %v1391_v5, %v809_v15 }
 0xa8c   :  { %v818_v30 = vsel %vm815_vm10, %v817_v27, %v813_v26 }
 0xa8d   :  { %v821_v41 = vmul.f32 %v818_v30, %v1743_v42 }
 0xa94   :  { %v787_v58 = vpop.permute.xlu2 %786 }
 0xa95   :  { %v789_v59 = vmul.f32 %v787_v58, %v781_v13 }
 0xa97   :  { %791 = vrot.lane.b32.xlu1 %v789_v59, %s1447_s8 }
 0xaea   :  { %v824_v28 = vpop.permute.xlu0 %823 }
 0xaeb   :  { %v826_v31 = vmul.f32 %v824_v28, %v818_v30 }
 0xaed   :  { %828 = vrot.lane.b32.xlu2 %v826_v31, %s1447_s8 }
 0xb09   :  { %v792_v34 = vpop.permute.xlu1 %791 }
 0xb0a   :  { %v1764_v37 = vadd.f32 %v792_v34, %v784_v33 }
 0xb0c   :  { %1392 = vtanh.f32 %v1764_v37 }
 0xb12   :  { %v1393_v38 = vpop.eup %1392 }
 0xb13   :  { %797 = vrot.lane.b32.xlu0 %v1393_v38, %s1446_s22 }
 0xb47   :  { %v829_v61 = vpop.permute.xlu2 %828 }
 0xb48   :  { %v1769_v25 = vadd.f32 %v829_v61, %v821_v41 }
 0xb4a   :  { %1394 = vtanh.f32 %v1769_v25 }
 0xb50   :  { %v1395_v45 = vpop.eup %1394 }
 0xb51   :  { %834 = vrot.lane.b32.xlu1 %v1395_v45, %s1446_s22 }
 0xb85   :  { %v798_v46 = vpop.permute.xlu0 %797 }
 0xb86   :  { %v800_v39 = vmul.f32 %v798_v46, %v781_v13 }
 0xb88   :  { %v1774_v10 = vadd.f32 %v800_v39, %v1748_v29  ;;  %v840_v47 = vpack.c.bf16 %v800_v39, %v800_v39 }
 0xb8a   :  { %842 = vrot.lane.b32.xlu2 %v840_v47, %s1447_s8 }
 0xbc3   :  { %v835_v23 = vpop.permute.xlu1 %834 }
 0xbc4   :  { %v837_v49 = vmul.f32 %v835_v23, %v818_v30 }
 0xbc6   :  { %v1778_v42 = vadd.f32 %v837_v49, %v1752_v40  ;;  %v861_v18 = vpack.c.bf16 %v837_v49, %v837_v49 }
 0xbc8   :  { %863 = vrot.lane.b32.xlu0 %v861_v18, %s1447_s8 }
 0xbe4   :  { %v843_v24 = vpop.permute.xlu2 %842 }
 0xbe5   :  { %1287 = vmatmul.msk.bf16.vlgmr.msra.gmra.mxu2 %vm65_vm0, %v843_v24 }
 0xc3a   :  { %v864_v4 = vpop.permute.xlu0 %863 }
 0xc3b   :  { %1288 = vmatmul.msk.bf16.vlgmr.msrb.gmra.mxu3 %vm65_vm0, %v864_v4 }
 0xc68   :  { %v856_v35 = vpop.f32.mrf.mxu2 }
 0xc69   :  { %v860_v29 = vadd.f32 %v856_v35, %v1627_v16 }
 0xc6b   :  { %1396 = vtanh.f32 %v860_v29  ;;  %v1289_v1 = vmul.f32 -1.442695, %v860_v29 }
 0xc6d   :  { %1398 = vpow2.f32 %v1289_v1 }
 0xc70   :  { %v858_v44 = vpop.f32.mrf.mxu2 }
 0xc71   :  { %v1397_v54 = vpop.eup %1396 }
 0xc72   :  { %904 = vrot.lane.b32.xlu1 %v1397_v54, %s1446_s22 }
 0xc73   :  { %v1399_v48 = vpop.eup %1398 }
 0xc74   :  { %v885_v17 = vadd.f32 1.0, %v1399_v48 }
 0xc76   :  { %v897_v6 = vand.u32 2147483648, %v885_v17  ;;  %vm891_vm12 = vweird.f32 %v885_v17  ;;  %v895_v53 = vand.u32 2147483647, %v885_v17 }
 0xc78   :  { %vm896_vm14 = vcmp.eq.f32.partialorder %v895_v53, 8.507059e+37 }
 0xcbe   :  { %v877_v40 = vpop.f32.mrf.mxu3 }
 0xcbf   :  { %v881_v14 = vadd.f32 %v877_v40, %v1614_v3  ;;  %v898_v3 = vor.u32 1.1754944e-38, %v897_v6 }
 0xcc1   :  { %1400 = vtanh.f32 %v881_v14  ;;  %v1290_v8 = vmul.f32 -1.442695, %v881_v14 }
 0xcc2   :  { %1402 = vrcp.f32 %v885_v17 }
 0xcc3   :  { %1404 = vpow2.f32 %v1290_v8 }
 0xcc6   :  { %v879_v50 = vpop.f32.mrf.mxu3 }
 0xcc7   :  { %v1401_v51 = vpop.eup %1400 }
 0xcc8   :  { %941 = vrot.lane.b32.xlu2 %v1401_v51, %s1446_s22  ;;  %v1403_v32 = vpop.eup %1402 }
 0xcc9   :  { %v887_v16 = vmul.f32 %v1403_v32, %v885_v17  ;;  %vm892_vm11 = vweird.f32 %v1403_v32  ;;  %v1405_v13 = vpop.eup %1404 }
 0xcca   :  { %vm893_vm13 = vmor %vm891_vm12, %vm892_vm11  ;;  %v922_v58 = vadd.f32 1.0, %v1405_v13 }
 0xccb   :  { %v888_v36 = vsub.f32 1.0, %v887_v16 }
 0xccc   :  { %1406 = vrcp.f32 %v922_v58  ;;  %v934_v7 = vand.u32 2147483648, %v922_v58  ;;  %vm928_vm1 = vweird.f32 %v922_v58  ;;  %v932_v9 = vand.u32 2147483647, %v922_v58 }
 0xccd   :  { %v889_v52 = vmul.f32 %v1403_v32, %v888_v36 }
 0xcce   :  { %v935_v15 = vor.u32 1.1754944e-38, %v934_v7  ;;  %vm933_vm3 = vcmp.eq.f32.partialorder %v932_v9, 8.507059e+37 }
 0xccf   :  { %v890_v11 = vadd.f32 %v1403_v32, %v889_v52 }
 0xcd1   :  { %v894_v55 = vsel %vm893_vm13, %v1403_v32, %v890_v11 }
 0xcd2   :  { %v899_v19 = vsel %vm896_vm14, %v898_v3, %v894_v55  ;;  %v1407_v59 = vpop.eup %1406 }
 0xcd3   :  { %v924_v62 = vmul.f32 %v1407_v59, %v922_v58  ;;  %vm929_vm15 = vweird.f32 %v1407_v59  ;;  %v902_v27 = vmul.f32 %v899_v19, %v1764_v37 }
 0xcd4   :  { %vm930_vm2 = vmor %vm928_vm1, %vm929_vm15 }
 0xcd5   :  { %v925_v63 = vsub.f32 1.0, %v924_v62 }
 0xcd7   :  { %v926_v2 = vmul.f32 %v1407_v59, %v925_v63 }
 0xcd9   :  { %v927_v5 = vadd.f32 %v1407_v59, %v926_v2 }
 0xcdb   :  { %v931_v12 = vsel %vm930_vm2, %v1407_v59, %v927_v5 }
 0xcdc   :  { %v936_v20 = vsel %vm933_vm3, %v935_v15, %v931_v12 }
 0xcdd   :  { %v939_v33 = vmul.f32 %v936_v20, %v1769_v25 }
 0xce4   :  { %v905_v56 = vpop.permute.xlu1 %904 }
 0xce5   :  { %v907_v57 = vmul.f32 %v905_v56, %v899_v19 }
 0xce7   :  { %909 = vrot.lane.b32.xlu0 %v907_v57, %s1447_s8 }
 0xd22   :  { %v942_v22 = vpop.permute.xlu2 %941 }
 0xd23   :  { %v944_v26 = vmul.f32 %v942_v22, %v936_v20 }
 0xd25   :  { %946 = vrot.lane.b32.xlu1 %v944_v26, %s1447_s8 }
 0xd59   :  { %v910_v28 = vpop.permute.xlu0 %909 }
 0xd5a   :  { %v1790_v30 = vadd.f32 %v910_v28, %v902_v27 }
 0xd5c   :  { %1408 = vtanh.f32 %v1790_v30 }
 0xd62   :  { %v1409_v31 = vpop.eup %1408 }
 0xd63   :  { %915 = vrot.lane.b32.xlu2 %v1409_v31, %s1446_s22 }
 0xd97   :  { %v947_v34 = vpop.permute.xlu1 %946 }
 0xd98   :  { %v1795_v38 = vadd.f32 %v947_v34, %v939_v33 }
 0xd9a   :  { %1410 = vtanh.f32 %v1795_v38 }
 0xda0   :  { %v1411_v41 = vpop.eup %1410 }
 0xda1   :  { %952 = vrot.lane.b32.xlu0 %v1411_v41, %s1446_s22 }
 0xdbd   :  { %v916_v61 = vpop.permute.xlu2 %915 }
 0xdbe   :  { %v918_v37 = vmul.f32 %v916_v61, %v899_v19 }
 0xdc0   :  { %v1800_v45 = vadd.f32 %v918_v37, %v1774_v10  ;;  %v958_v46 = vpack.c.bf16 %v918_v37, %v918_v37 }
 0xdc2   :  { %960 = vrot.lane.b32.xlu1 %v958_v46, %s1447_s8 }
 0xe13   :  { %v953_v39 = vpop.permute.xlu0 %952 }
 0xe14   :  { %v955_v47 = vmul.f32 %v953_v39, %v936_v20 }
 0xe16   :  { %v1804_v25 = vadd.f32 %v955_v47, %v1778_v42  ;;  %v979_v23 = vpack.c.bf16 %v955_v47, %v955_v47 }
 0xe18   :  { %981 = vrot.lane.b32.xlu2 %v979_v23, %s1447_s8 }
 0xe34   :  { %v961_v49 = vpop.permute.xlu1 %960 }
 0xe35   :  { %1291 = vmatmul.msk.bf16.vlgmr.msrb.gmra.mxu0 %vm65_vm0, %v961_v49 }
 0xe72   :  { %v982_v18 = vpop.permute.xlu2 %981 }
 0xe73   :  { %1292 = vmatmul.msk.bf16.vlgmr.msrb.gmra.mxu1 %vm65_vm0, %v982_v18 }
 0xeb2   :  { %v974_v24 = vpop.f32.mrf.mxu0 }
 0xeb3   :  { %v978_v10 = vadd.f32 %v974_v24, %v1632_v21 }
 0xeb5   :  { %1412 = vtanh.f32 %v978_v10  ;;  %v1293_v1 = vmul.f32 -1.442695, %v978_v10 }
 0xeba   :  { %v976_v4 = vpop.f32.mrf.mxu0 }
 0xebb   :  { %v1413_v35 = vpop.eup %1412 }
 0xebc   :  { %1022 = vrot.lane.b32.xlu0 %v1413_v35, %s1446_s22 }
 0xef0   :  { %v995_v29 = vpop.f32.mrf.mxu1 }
 0xef1   :  { %v999_v42 = vadd.f32 %v995_v29, %v1610_v0 }
 0xef3   :  { %1414 = vtanh.f32 %v999_v42  ;;  %v1294_v53 = vmul.f32 -1.442695, %v999_v42 }
 0xef4   :  { %1416 = vpow2.f32 %v1293_v1 }
 0xef8   :  { %v997_v44 = vpop.f32.mrf.mxu1 }
 0xef9   :  { %v1415_v54 = vpop.eup %1414 }
 0xefa   :  { %1059 = vrot.lane.b32.xlu1 %v1415_v54, %s1446_s22  ;;  %v1417_v40 = vpop.eup %1416 }
 0xefb   :  { %v1003_v14 = vadd.f32 1.0, %v1417_v40 }
 0xefd   :  { %1418 = vrcp.f32 %v1003_v14  ;;  %v1015_v32 = vand.u32 2147483648, %v1003_v14  ;;  %vm1009_vm5 = vweird.f32 %v1003_v14  ;;  %v1013_v16 = vand.u32 2147483647, %v1003_v14 }
 0xefe   :  { %1420 = vpow2.f32 %v1294_v53 }
 0xeff   :  { %v1016_v36 = vor.u32 1.1754944e-38, %v1015_v32  ;;  %vm1014_vm7 = vcmp.eq.f32.partialorder %v1013_v16, 8.507059e+37 }
 0xf03   :  { %v1419_v48 = vpop.eup %1418 }
 0xf04   :  { %v1005_v21 = vmul.f32 %v1419_v48, %v1003_v14  ;;  %vm1010_vm4 = vweird.f32 %v1419_v48  ;;  %v1421_v55 = vpop.eup %1420 }
 0xf05   :  { %vm1011_vm6 = vmor %vm1009_vm5, %vm1010_vm4  ;;  %v1040_v3 = vadd.f32 1.0, %v1421_v55  ;;  %vm1198_vm4 = vcmask 257024   ;;  %vm1204_vm5 = vcmask 519424  }
 0xf06   :  { %v1006_v17 = vsub.f32 1.0, %v1005_v21 }
 0xf07   :  { %1422 = vrcp.f32 %v1040_v3  ;;  %v1052_v58 = vand.u32 2147483648, %v1040_v3  ;;  %vm1046_vm9 = vweird.f32 %v1040_v3  ;;  %v1050_v59 = vand.u32 2147483647, %v1040_v3 }
 0xf08   :  { %v1007_v50 = vmul.f32 %v1419_v48, %v1006_v17 }
 0xf09   :  { %v1053_v63 = vor.u32 1.1754944e-38, %v1052_v58  ;;  %vm1051_vm11 = vcmp.eq.f32.partialorder %v1050_v59, 8.507059e+37 }
 0xf0a   :  { %v1008_v51 = vadd.f32 %v1419_v48, %v1007_v50 }
 0xf0c   :  { %v1012_v0 = vsel %vm1011_vm6, %v1419_v48, %v1008_v51  ;;  %vm1209_vm6 = vcmask 785924  }
 0xf0d   :  { %v1017_v11 = vsel %vm1014_vm7, %v1016_v36, %v1012_v0  ;;  %v1423_v56 = vpop.eup %1422  ;;  %vm1211_vm7 = vcmask 1048324  }
 0xf0e   :  { %v1042_v19 = vmul.f32 %v1423_v56, %v1040_v3  ;;  %vm1047_vm8 = vweird.f32 %v1423_v56  ;;  %v1020_v9 = vmul.f32 %v1017_v11, %v1790_v30 }
 0xf0f   :  { %vm1048_vm10 = vmor %vm1046_vm9, %vm1047_vm8 }
 0xf10   :  { %v1043_v57 = vsub.f32 1.0, %v1042_v19 }
 0xf12   :  { %v1044_v8 = vmul.f32 %v1423_v56, %v1043_v57 }
 0xf14   :  { %v1045_v13 = vadd.f32 %v1423_v56, %v1044_v8 }
 0xf16   :  { %v1049_v62 = vsel %vm1048_vm10, %v1423_v56, %v1045_v13 }
 0xf17   :  { %v1054_v5 = vsel %vm1051_vm11, %v1053_v63, %v1049_v62 }
 0xf18   :  { %v1057_v22 = vmul.f32 %v1054_v5, %v1795_v38 }
 0xf2e   :  { %v1023_v52 = vpop.permute.xlu0 %1022 }
 0xf2f   :  { %v1025_v6 = vmul.f32 %v1023_v52, %v1017_v11 }
 0xf31   :  { %1027 = vrot.lane.b32.xlu2 %v1025_v6, %s1447_s8 }
 0xf6c   :  { %v1060_v2 = vpop.permute.xlu1 %1059 }
 0xf6d   :  { %v1062_v7 = vmul.f32 %v1060_v2, %v1054_v5 }
 0xf6f   :  { %1064 = vrot.lane.b32.xlu0 %v1062_v7, %s1447_s8 }
 0xf8b   :  { %v1028_v12 = vpop.permute.xlu2 %1027 }
 0xf8c   :  { %v1816_v15 = vadd.f32 %v1028_v12, %v1020_v9 }
 0xf8e   :  { %1424 = vtanh.f32 %v1816_v15 }
 0xf94   :  { %v1425_v20 = vpop.eup %1424 }
 0xf95   :  { %1033 = vrot.lane.b32.xlu1 %v1425_v20, %s1446_s22 }
 0xfe1   :  { %v1065_v26 = vpop.permute.xlu0 %1064 }
 0xfe2   :  { %v1821_v27 = vadd.f32 %v1065_v26, %v1057_v22 }
 0xfe4   :  { %1426 = vtanh.f32 %v1821_v27 }
 0xfea   :  { %v1427_v28 = vpop.eup %1426 }
 0xfeb   :  { %1070 = vrot.lane.b32.xlu2 %v1427_v28, %s1446_s22 }
0x1007   :  { %v1034_v31 = vpop.permute.xlu1 %1033 }
0x1008   :  { %v1036_v30 = vmul.f32 %v1034_v31, %v1017_v11 }
0x100a   :  { %v1826_v33 = vadd.f32 %v1036_v30, %v1800_v45  ;;  %v1076_v34 = vpack.c.bf16 %v1036_v30, %v1036_v30  ;;  %v1444_v45 = vld [vmem:[%s1867_s5] ss:$0 sm:$0xff]  ;;  %s1448_s5 = smov 96  }
0x100b   :  { %v178_v47 = vadd.f32 %v1444_v45, %v1699_v43 }
0x100c   :  { %1078 = vrot.lane.b32.xlu0 %v1076_v34, %s1447_s8 }
0x1045   :  { %v1071_v41 = vpop.permute.xlu2 %1070 }
0x1046   :  { %v1073_v61 = vmul.f32 %v1071_v41, %v1054_v5 }
0x1048   :  { %v1830_v38 = vadd.f32 %v1073_v61, %v1804_v25  ;;  %v1097_v37 = vpack.c.bf16 %v1073_v61, %v1073_v61 }
0x104a   :  { %1099 = vrot.lane.b32.xlu1 %v1097_v37, %s1447_s8 }
0x107e   :  { %v1079_v46 = vpop.permute.xlu0 %1078 }
0x107f   :  { %1295 = vmatmul.msk.bf16.vlgmr.msrb.gmra.mxu2 %vm65_vm0, %v1079_v46 }
0x10bc   :  { %v1100_v39 = vpop.permute.xlu1 %1099 }
0x10bd   :  { %1296 = vmatmul.msk.bf16.vlgmr.msra.gmra.mxu3 %vm65_vm0, %v1100_v39 }
0x1102   :  { %v1092_v23 = vpop.f32.mrf.mxu2 }
0x1103   :  { %v1096_v49 = vadd.f32 %v1092_v23, %v178_v47 }
0x1105   :  { %1428 = vtanh.f32 %v1096_v49  ;;  %v1297_v24 = vmul.f32 -1.442695, %v1096_v49 }
0x1107   :  { %1430 = vpow2.f32 %v1297_v24 }
0x110a   :  { %v1094_v25 = vpop.f32.mrf.mxu2 }
0x110b   :  { %v1429_v18 = vpop.eup %1428 }
0x110c   :  { %1140 = vrot.lane.b32.xlu2 %v1429_v18, %s1446_s22 }
0x110d   :  { %v1431_v35 = vpop.eup %1430 }
0x110e   :  { %v1121_v29 = vadd.f32 1.0, %v1431_v35 }
0x1110   :  { %v1133_v48 = vand.u32 2147483648, %v1121_v29  ;;  %vm1127_vm12 = vweird.f32 %v1121_v29  ;;  %v1131_v21 = vand.u32 2147483647, %v1121_v29 }
0x1112   :  { %vm1132_vm14 = vcmp.eq.f32.partialorder %v1131_v21, 8.507059e+37 }
0x1140   :  { %v1113_v10 = vpop.f32.mrf.mxu3 }
0x1141   :  { %v1117_v4 = vadd.f32 %v1113_v10, %v1605_v60  ;;  %v1134_v60 = vor.u32 1.1754944e-38, %v1133_v48 }
0x1143   :  { %1432 = vtanh.f32 %v1117_v4  ;;  %v1298_v16 = vmul.f32 -1.442695, %v1117_v4 }
0x1144   :  { %1434 = vrcp.f32 %v1121_v29 }
0x1145   :  { %1436 = vpow2.f32 %v1298_v16 }
0x1148   :  { %v1115_v42 = vpop.f32.mrf.mxu3 }
0x1149   :  { %v1433_v44 = vpop.eup %1432 }
0x114a   :  { %1177 = vrot.lane.b32.xlu0 %v1433_v44, %s1446_s22  ;;  %v1435_v43 = vpop.eup %1434 }
0x114b   :  { %v1123_v54 = vmul.f32 %v1435_v43, %v1121_v29  ;;  %vm1128_vm0 = vweird.f32 %v1435_v43  ;;  %v1437_v0 = vpop.eup %1436 }
0x114c   :  { %vm1129_vm13 = vmor %vm1127_vm12, %vm1128_vm0  ;;  %v1158_v36 = vadd.f32 1.0, %v1437_v0 }
0x114d   :  { %v1124_v1 = vsub.f32 1.0, %v1123_v54 }
0x114e   :  { %1438 = vrcp.f32 %v1158_v36  ;;  %v1170_v3 = vand.u32 2147483648, %v1158_v36  ;;  %vm1164_vm1 = vweird.f32 %v1158_v36  ;;  %v1168_v56 = vand.u32 2147483647, %v1158_v36 }
0x114f   :  { %v1125_v40 = vmul.f32 %v1435_v43, %v1124_v1 }
0x1150   :  { %v1171_v57 = vor.u32 1.1754944e-38, %v1170_v3  ;;  %vm1169_vm3 = vcmp.eq.f32.partialorder %v1168_v56, 8.507059e+37 }
0x1151   :  { %v1126_v14 = vadd.f32 %v1435_v43, %v1125_v40 }
0x1153   :  { %v1130_v17 = vsel %vm1129_vm13, %v1435_v43, %v1126_v14 }
0x1154   :  { %v1135_v50 = vsel %vm1132_vm14, %v1134_v60, %v1130_v17  ;;  %v1439_v52 = vpop.eup %1438 }
0x1155   :  { %v1160_v11 = vmul.f32 %v1439_v52, %v1158_v36  ;;  %vm1165_vm15 = vweird.f32 %v1439_v52  ;;  %v1138_v59 = vmul.f32 %v1135_v50, %v1816_v15 }
0x1156   :  { %vm1166_vm2 = vmor %vm1164_vm1, %vm1165_vm15 }
0x1157   :  { %v1161_v6 = vsub.f32 1.0, %v1160_v11 }
0x1159   :  { %v1162_v53 = vmul.f32 %v1439_v52, %v1161_v6 }
0x115b   :  { %v1163_v55 = vadd.f32 %v1439_v52, %v1162_v53 }
0x115d   :  { %v1167_v19 = vsel %vm1166_vm2, %v1439_v52, %v1163_v55 }
0x115e   :  { %v1172_v13 = vsel %vm1169_vm3, %v1171_v57, %v1167_v19 }
0x115f   :  { %v1175_v5 = vmul.f32 %v1172_v13, %v1821_v27 }
0x1166   :  { %v1141_v51 = vpop.permute.xlu2 %1140 }
0x1167   :  { %v1143_v32 = vmul.f32 %v1141_v51, %v1135_v50 }
0x1169   :  { %1145 = vrot.lane.b32.xlu1 %v1143_v32, %s1447_s8 }
0x11bc   :  { %v1178_v8 = vpop.permute.xlu0 %1177 }
0x11bd   :  { %v1180_v58 = vmul.f32 %v1178_v8, %v1172_v13 }
0x11bf   :  { %1182 = vrot.lane.b32.xlu2 %v1180_v58, %s1447_s8 }
0x11db   :  { %v1146_v62 = vpop.permute.xlu1 %1145 }
0x11dc   :  { %v1148_v63 = vadd.f32 %v1146_v62, %v1138_v59 }
0x11de   :  { %1440 = vtanh.f32 %v1148_v63 }
0x11e4   :  { %v1441_v2 = vpop.eup %1440 }
0x11e5   :  { %1151 = vrot.lane.b32.xlu0 %v1441_v2, %s1446_s22 }
0x1219   :  { %v1183_v7 = vpop.permute.xlu2 %1182 }
0x121a   :  { %v1185_v9 = vadd.f32 %v1183_v7, %v1175_v5 }
0x121c   :  { %1442 = vtanh.f32 %v1185_v9 }
0x1222   :  { %v1443_v12 = vpop.eup %1442 }
0x1223   :  { %1188 = vrot.lane.b32.xlu1 %v1443_v12, %s1446_s22 }
0x1257   :  { %v1152_v20 = vpop.permute.xlu0 %1151 }
0x1258   :  { %v1154_v22 = vmul.f32 %v1152_v20, %v1135_v50 }
0x125a   :  { %v1192_v26 = vadd.f32 %v1154_v22, %v1826_v33 }
0x125c   :  { %1195 = vrot.lane.b32.xlu2 %v1192_v26, %s1447_s8  ;;  %1206 = vrot.lane.b32.xlu1 %v1192_v26, %s1448_s5 }
0x1295   :  { %v1189_v15 = vpop.permute.xlu1 %1188 }
0x1296   :  { %v1191_v28 = vmul.f32 %v1189_v15, %v1172_v13 }
0x1298   :  { %v1193_v31 = vadd.f32 %v1191_v28, %v1830_v38 }
0x129a   :  { %1201 = vrot.lane.b32.xlu0 %v1193_v31, %s1446_s22 }
0x12b6   :  { %v1196_v27 = vpop.permute.xlu2 %1195 }
0x12b7   :  { %1199 = vst.msk [vmem:[%s1873_s9] sm:$0xf] %vm1198_vm4, %v1196_v27 }
0x12ce   :  { %v1207_v33 = vpop.permute.xlu1 %1206 }
0x130c   :  { %v1202_v30 = vpop.permute.xlu0 %1201 }
0x130d   :  { %1205 = vst.msk [vmem:[%s1873_s9] sm:$0xf] %vm1204_vm5, %v1202_v30 }
0x130e   :  { %1210 = vst.msk [vmem:[%s1873_s9 - $0x4] sm:$0xf0] %vm1209_vm6, %v1207_v33 }
0x130f   :  { %1212 = vst.msk [vmem:[%s1873_s9 - $0x4] sm:$0xf0] %vm1211_vm7, %v1193_v31 }

</bundles_post_ra>
